<compile_context>
chip_gen: v5e
topology: v5e:2x2
jax: 0.10.0
libtpu: 0.0.40
codegen_flags: <defaults>
</compile_context>

<pallas_src>
import functools

import jax
import jax.numpy as jnp
from jax import lax
from jax.experimental import pallas as pl
from jax.experimental.pallas import tpu as pltpu

EPS = 1e-5
GUARD = 8  # zero guard rows (sublane aligned) around each flattened image


# ------------------------------ Pallas kernel ------------------------------ #

def _basic_block_kernel(x_ref, w1_ref, b1_ref, w2_ref, b2_ref, mask_ref,
                        r_ref, remb_ref, o_ref, y1s_ref, *,
                        stride, Ho, Wo, Cin, Cp, Cres):
    """Fused conv1*bn1 -> conv2*bn2 -> +residual -> ReLU for one batch element.

    Spatial layout is a flattened (Ho+2, Wo+2) grid with zero guard rows, so
    every 3x3 tap is a contiguous statically-addressed row slice feeding one
    MXU matmul.  Ring columns of conv1's output are zeroed with a mask so they
    act as conv2's padding; ring columns of the final output are sliced off on
    the host.
    """
    Wp = Wo + 2
    Lq = Ho * Wp                      # rows computed (interior image rows)
    Lx = (Ho + 2) * Wp + 2 * GUARD    # per-phase flattened length incl. guards
    q0 = GUARD + Wp                   # flat offset of the first computed row

    # ---- conv1 (BN1 scale folded into w1): 9 shifted bf16 matmuls, f32 acc --
    acc1 = jnp.zeros((Lq, Cp), jnp.float32)
    for kh in range(3):
        for kw in range(3):
            if stride == 1:
                p, shift = 0, (kh - 1) * Wp + (kw - 1)
            else:  # stride 2: host did a 2x2 phase split (space-to-depth)
                p = (kh % 2) * 2 + (kw % 2)
                shift = (kh // 2 - 1) * Wp + (kw // 2 - 1)
            start = p * Lx + q0 + shift
            xs = x_ref[0, start:start + Lq, :]
            wk = w1_ref[(kh * 3 + kw) * Cin:(kh * 3 + kw + 1) * Cin, :]
            acc1 = acc1 + jnp.dot(xs, wk, preferred_element_type=jnp.float32)

    # BN1 bias, zero the halo columns, stage as bf16 in VMEM (no HBM trip).
    y1 = (acc1 + b1_ref[...]) * mask_ref[...]
    y1s_ref[...] = jnp.zeros_like(y1s_ref)
    y1s_ref[q0:q0 + Lq, :] = y1.astype(y1s_ref.dtype)

    # ---- conv2 (BN2 scale folded into w2) -----------------------------------
    acc2 = jnp.zeros((Lq, Cp), jnp.float32)
    for kh in range(3):
        for kw in range(3):
            shift = (kh - 1) * Wp + (kw - 1)
            ys = y1s_ref[q0 + shift:q0 + shift + Lq, :]
            wk = w2_ref[(kh * 3 + kw) * Cp:(kh * 3 + kw + 1) * Cp, :]
            acc2 = acc2 + jnp.dot(ys, wk, preferred_element_type=jnp.float32)

    # ---- BN2 bias + residual + ReLU (all f32) -------------------------------
    if Cres == Cp:
        res = r_ref[0]
    else:
        # Channel-embed the narrow residual via a constant [I | 0] matmul so
        # the zero-channel half of the shortcut never exists in HBM.
        res = jnp.dot(r_ref[0], remb_ref[...], preferred_element_type=jnp.float32)
    o_ref[0] = jnp.maximum(acc2 + b2_ref[...] + res, 0.0)


# ------------------------------- JAX glue ----------------------------------- #

def _prep_conv1_stream(x_nhwc, stride, Ho, Wo):
    """Flatten (and phase-split for stride 2) the padded NHWC input so every
    in-kernel 3x3 tap is a contiguous row range.  Returns (N, P*Lx, Cin) bf16."""
    N, H, W, Cin = x_nhwc.shape
    Hp, Wp = Ho + 2, Wo + 2
    xpad = jnp.pad(x_nhwc, ((0, 0), (1, 1), (1, 1), (0, 0)))
    if stride == 1:
        phases = xpad[:, None]                                   # (N,1,Hp,Wp,C)
    else:
        ph = xpad.reshape(N, Ho + 1, 2, Wo + 1, 2, Cin)
        ph = ph.transpose(0, 2, 4, 1, 3, 5)                      # (N,2,2,Ho+1,Wo+1,C)
        ph = jnp.pad(ph, ((0, 0), (0, 0), (0, 0), (0, 1), (0, 1), (0, 0)))
        phases = ph.reshape(N, 4, Hp, Wp, Cin)
    P = phases.shape[1]
    flat = phases.reshape(N, P, Hp * Wp, Cin)
    flat = jnp.pad(flat, ((0, 0), (0, 0), (GUARD, GUARD), (0, 0)))
    return flat.reshape(N, P * (Hp * Wp + 2 * GUARD), Cin).astype(jnp.bfloat16)


def basic_block_forward(x_nchw, params, stride, shortcut):
    """Pallas implementation of BasicBlock.forward (eval-mode BN)."""
    x = jnp.transpose(x_nchw, (0, 2, 3, 1)).astype(jnp.float32)   # NHWC
    N, H, W, Cin = x.shape
    w1, w2 = params["w1"], params["w2"]                            # OIHW
    Cp = w1.shape[0]

    if stride == 2:
        assert H % 2 == 0 and W % 2 == 0
    Ho, Wo = H // stride, W // stride
    Hp, Wp = Ho + 2, Wo + 2
    Lq = Ho * Wp
    Lx = Hp * Wp + 2 * GUARD
    P = 1 if stride == 1 else 4

    # fold eval-mode BN into per-channel scale/bias; fold scale into weights
    s1 = params["g1"] / jnp.sqrt(params["rv1"] + EPS)
    b1 = (params["b1"] - params["rm1"] * s1).reshape(1, Cp).astype(jnp.float32)
    s2 = params["g2"] / jnp.sqrt(params["rv2"] + EPS)
    b2 = (params["b2"] - params["rm2"] * s2).reshape(1, Cp).astype(jnp.float32)
    # OIHW -> (kh, kw, cin, cout), scale folded along cout, bf16 for the MXU
    w1m = (jnp.transpose(w1, (2, 3, 1, 0)) * s1).reshape(9 * Cin, Cp).astype(jnp.bfloat16)
    w2m = (jnp.transpose(w2, (2, 3, 1, 0)) * s2).reshape(9 * Cp, Cp).astype(jnp.bfloat16)

    # conv1 input stream (flattened, zero-guarded, phase-split if stride 2)
    x1 = _prep_conv1_stream(x, stride, Ho, Wo)
    assert x1.shape == (N, P * Lx, Cin)

    # residual: AvgPool2d(2) (shortcut) or identity; kept at native channel width
    if shortcut:
        res_img = x.reshape(N, Ho, 2, Wo, 2, Cin).mean(axis=(2, 4))
    else:
        assert stride == 1 and Cin == Cp
        res_img = x
    Cres = res_img.shape[-1]
    res = jnp.pad(res_img, ((0, 0), (0, 0), (1, 1), (0, 0))).reshape(N, Lq, Cres)
    remb = jnp.eye(Cres, Cp, dtype=jnp.float32)            # constant [I | 0]

    # halo-column mask for conv1's output (gives conv2 proper zero padding)
    col = jnp.arange(Lq, dtype=jnp.int32) % Wp
    mask = ((col >= 1) & (col <= Wo)).astype(jnp.float32).reshape(Lq, 1)

    kernel = functools.partial(_basic_block_kernel, stride=stride,
                               Ho=Ho, Wo=Wo, Cin=Cin, Cp=Cp, Cres=Cres)

    out_flat = pl.pallas_call(
        kernel,
        out_shape=jax.ShapeDtypeStruct((N, Lq, Cp), jnp.float32),
        grid=(N,),
        in_specs=[
            pl.BlockSpec((1, P * Lx, Cin), lambda n: (n, 0, 0)),   # x stream
            pl.BlockSpec((9 * Cin, Cp), lambda n: (0, 0)),         # w1 (scaled)
            pl.BlockSpec((1, Cp), lambda n: (0, 0)),               # b1
            pl.BlockSpec((9 * Cp, Cp), lambda n: (0, 0)),          # w2 (scaled)
            pl.BlockSpec((1, Cp), lambda n: (0, 0)),               # b2
            pl.BlockSpec((Lq, 1), lambda n: (0, 0)),               # halo mask
            pl.BlockSpec((1, Lq, Cres), lambda n: (n, 0, 0)),      # residual
            pl.BlockSpec((Cres, Cp), lambda n: (0, 0)),            # [I | 0]
        ],
        out_specs=pl.BlockSpec((1, Lq, Cp), lambda n: (n, 0, 0)),
        scratch_shapes=[pltpu.VMEM((Lx, Cp), jnp.bfloat16)],       # staged y1
        compiler_params=pltpu.CompilerParams(
            dimension_semantics=("parallel",)),
    )(x1, w1m, b1, w2m, b2, mask, res, remb)

    y = out_flat.reshape(N, Ho, Wp, Cp)[:, :, 1:1 + Wo, :]         # drop halo cols
    return jnp.transpose(y, (0, 3, 1, 2))                          # back to NCHW


# -------------------------- reference & params ------------------------------ #

def ref_forward(x_nchw, params, stride, shortcut):
    dn = ("NCHW", "OIHW", "NCHW")

    def bn(y, g, b, rm, rv):
        return ((y - rm[None, :, None, None])
                / jnp.sqrt(rv[None, :, None, None] + EPS)
                * g[None, :, None, None] + b[None, :, None, None])

    y = lax.conv_general_dilated(x_nchw, params["w1"], (stride, stride),
                                 ((1, 1), (1, 1)), dimension_numbers=dn)
    y = bn(y, params["g1"], params["b1"], params["rm1"], params["rv1"])
    y = lax.conv_general_dilated(y, params["w2"], (1, 1),
                                 ((1, 1), (1, 1)), dimension_numbers=dn)
    y = bn(y, params["g2"], params["b2"], params["rm2"], params["rv2"])
    if shortcut:
        N, C, H, W = x_nchw.shape
        pooled = x_nchw.reshape(N, C, H // 2, 2, W // 2, 2).mean(axis=(3, 5))
        residual = jnp.concatenate([pooled, jnp.zeros_like(pooled)], axis=1)
    else:
        residual = x_nchw
    return jnp.maximum(y + residual, 0.0)


def init_params(key, cin, cout):
    ks = jax.random.split(key, 12)
    f32 = jnp.float32
    return {
        "w1": 0.1 * jax.random.normal(ks[0], (cout, cin, 3, 3), f32),
        "g1": 1.0 + 0.1 * jax.random.normal(ks[1], (cout,), f32),
        "b1": 0.1 * jax.random.normal(ks[2], (cout,), f32),
        "rm1": 0.1 * jax.random.normal(ks[3], (cout,), f32),
        "rv1": 1.0 + 0.1 * jnp.abs(jax.random.normal(ks[4], (cout,), f32)),
        "w2": 0.1 * jax.random.normal(ks[5], (cout, cout, 3, 3), f32),
        "g2": 1.0 + 0.1 * jax.random.normal(ks[6], (cout,), f32),
        "b2": 0.1 * jax.random.normal(ks[7], (cout,), f32),
        "rm2": 0.1 * jax.random.normal(ks[8], (cout,), f32),
        "rv2": 1.0 + 0.1 * jnp.abs(jax.random.normal(ks[9], (cout,), f32)),
    }


if __name__ == "__main__":
    key = jax.random.PRNGKey(0)
    kx, kp1, kp2 = jax.random.split(key, 3)

    N, Cin, H, W = 2, 4, 16, 16
    x = jax.random.normal(kx, (N, Cin, H, W), jnp.float32)

    fwd = jax.jit(basic_block_forward, static_argnames=("stride", "shortcut"))

    # Case 1: shortcut=1 (stride=2, planes = 2*in_planes)
    params_sc = init_params(kp1, Cin, 2 * Cin)
    out = jax.block_until_ready(fwd(x, params_sc, stride=2, shortcut=1))
    ref = ref_forward(x, params_sc, 2, 1)
    assert out.shape == (N, 2 * Cin, H // 2, W // 2)
    assert jnp.allclose(out, ref, atol=5e-2, rtol=5e-2)

    # Case 2: shortcut=0 (stride=1, planes = in_planes, identity residual)
    params_id = init_params(kp2, Cin, Cin)
    out2 = jax.block_until_ready(fwd(x, params_id, stride=1, shortcut=0))
    ref2 = ref_forward(x, params_id, 1, 0)
    assert out2.shape == x.shape
    assert jnp.allclose(out2, ref2, atol=5e-2, rtol=5e-2)

    print("KERNEL_OK")
</pallas_src>

<mosaic_0001>
module attributes {stable_mosaic.version = 11 : i64} {
  func.func @_basic_block_kernel(%arg0: i32, %arg1: memref<1x464x4xbf16, #tpu.memory_space<vmem>>, %arg2: memref<36x8xbf16, #tpu.memory_space<vmem>>, %arg3: memref<1x8xf32, #tpu.memory_space<vmem>>, %arg4: memref<72x8xbf16, #tpu.memory_space<vmem>>, %arg5: memref<1x8xf32, #tpu.memory_space<vmem>>, %arg6: memref<80x1xf32, #tpu.memory_space<vmem>>, %arg7: memref<1x80x4xf32, #tpu.memory_space<vmem>>, %arg8: memref<4x8xf32, #tpu.memory_space<vmem>>, %arg9: memref<1x80x8xf32, #tpu.memory_space<vmem>>, %arg10: memref<116x8xbf16, #tpu.memory_space<vmem>>) attributes {dimension_semantics = [#tpu.dimension_semantics<parallel>], iteration_bounds = array<i64: 2>, scalar_prefetch = 0 : i64, scratch_operands = 1 : i64, tpu.core_type = #tpu.core_type<tc>, window_params = [{transform_indices = @transform_0, window_bounds = array<i64: 1, 464, 4>}, {pipeline_mode = #tpu.pipeline_mode<synchronous>, transform_indices = @transform_1, window_bounds = array<i64: 36, 8>}, {pipeline_mode = #tpu.pipeline_mode<synchronous>, transform_indices = @transform_2, window_bounds = array<i64: 1, 8>}, {pipeline_mode = #tpu.pipeline_mode<synchronous>, transform_indices = @transform_3, window_bounds = array<i64: 72, 8>}, {pipeline_mode = #tpu.pipeline_mode<synchronous>, transform_indices = @transform_4, window_bounds = array<i64: 1, 8>}, {pipeline_mode = #tpu.pipeline_mode<synchronous>, transform_indices = @transform_5, window_bounds = array<i64: 80, 1>}, {transform_indices = @transform_6, window_bounds = array<i64: 1, 80, 4>}, {pipeline_mode = #tpu.pipeline_mode<synchronous>, transform_indices = @transform_7, window_bounds = array<i64: 4, 8>}, {transform_indices = @transform_8, window_bounds = array<i64: 1, 80, 8>}]} {
    %cst = arith.constant 0.000000e+00 : f32
    %0 = vector.broadcast %cst : f32 to vector<80x8xf32>
    %c0 = arith.constant 0 : index
    %c7 = arith.constant 7 : index
    %c0_0 = arith.constant 0 : index
    %1 = vector.load %arg1[%c0, %c7, %c0_0] : memref<1x464x4xbf16, #tpu.memory_space<vmem>>, vector<1x80x4xbf16>
    %2 = vector.shape_cast %1 : vector<1x80x4xbf16> to vector<80x4xbf16>
    %c0_1 = arith.constant 0 : index
    %c0_2 = arith.constant 0 : index
    %3 = vector.load %arg2[%c0_1, %c0_2] : memref<36x8xbf16, #tpu.memory_space<vmem>>, vector<4x8xbf16>
    %cst_3 = arith.constant dense<0.000000e+00> : vector<80x8xf32>
    %4 = tpu.matmul %2, %3, %cst_3 {dimension_numbers = #tpu.dot_dimension_numbers<[1], [0], [0], [1], [0, 0, 1, 1], [], []>} : vector<80x4xbf16>, vector<4x8xbf16>, vector<80x8xf32> -> vector<80x8xf32>
    %5 = arith.addf %0, %4 : vector<80x8xf32>
    %c0_4 = arith.constant 0 : index
    %c123 = arith.constant 123 : index
    %c0_5 = arith.constant 0 : index
    %6 = vector.load %arg1[%c0_4, %c123, %c0_5] : memref<1x464x4xbf16, #tpu.memory_space<vmem>>, vector<1x80x4xbf16>
    %7 = vector.shape_cast %6 : vector<1x80x4xbf16> to vector<80x4xbf16>
    %c4 = arith.constant 4 : index
    %c0_6 = arith.constant 0 : index
    %8 = vector.load %arg2[%c4, %c0_6] : memref<36x8xbf16, #tpu.memory_space<vmem>>, vector<4x8xbf16>
    %cst_7 = arith.constant dense<0.000000e+00> : vector<80x8xf32>
    %9 = tpu.matmul %7, %8, %cst_7 {dimension_numbers = #tpu.dot_dimension_numbers<[1], [0], [0], [1], [0, 0, 1, 1], [], []>} : vector<80x4xbf16>, vector<4x8xbf16>, vector<80x8xf32> -> vector<80x8xf32>
    %10 = arith.addf %5, %9 : vector<80x8xf32>
    %c0_8 = arith.constant 0 : index
    %c8 = arith.constant 8 : index
    %c0_9 = arith.constant 0 : index
    %11 = vector.load %arg1[%c0_8, %c8, %c0_9] : memref<1x464x4xbf16, #tpu.memory_space<vmem>>, vector<1x80x4xbf16>
    %12 = vector.shape_cast %11 : vector<1x80x4xbf16> to vector<80x4xbf16>
    %c8_10 = arith.constant 8 : index
    %c0_11 = arith.constant 0 : index
    %13 = vector.load %arg2[%c8_10, %c0_11] : memref<36x8xbf16, #tpu.memory_space<vmem>>, vector<4x8xbf16>
    %cst_12 = arith.constant dense<0.000000e+00> : vector<80x8xf32>
    %14 = tpu.matmul %12, %13, %cst_12 {dimension_numbers = #tpu.dot_dimension_numbers<[1], [0], [0], [1], [0, 0, 1, 1], [], []>} : vector<80x4xbf16>, vector<4x8xbf16>, vector<80x8xf32> -> vector<80x8xf32>
    %15 = arith.addf %10, %14 : vector<80x8xf32>
    %c0_13 = arith.constant 0 : index
    %c239 = arith.constant 239 : index
    %c0_14 = arith.constant 0 : index
    %16 = vector.load %arg1[%c0_13, %c239, %c0_14] : memref<1x464x4xbf16, #tpu.memory_space<vmem>>, vector<1x80x4xbf16>
    %17 = vector.shape_cast %16 : vector<1x80x4xbf16> to vector<80x4xbf16>
    %c12 = arith.constant 12 : index
    %c0_15 = arith.constant 0 : index
    %18 = vector.load %arg2[%c12, %c0_15] : memref<36x8xbf16, #tpu.memory_space<vmem>>, vector<4x8xbf16>
    %cst_16 = arith.constant dense<0.000000e+00> : vector<80x8xf32>
    %19 = tpu.matmul %17, %18, %cst_16 {dimension_numbers = #tpu.dot_dimension_numbers<[1], [0], [0], [1], [0, 0, 1, 1], [], []>} : vector<80x4xbf16>, vector<4x8xbf16>, vector<80x8xf32> -> vector<80x8xf32>
    %20 = arith.addf %15, %19 : vector<80x8xf32>
    %c0_17 = arith.constant 0 : index
    %c355 = arith.constant 355 : index
    %c0_18 = arith.constant 0 : index
    %21 = vector.load %arg1[%c0_17, %c355, %c0_18] : memref<1x464x4xbf16, #tpu.memory_space<vmem>>, vector<1x80x4xbf16>
    %22 = vector.shape_cast %21 : vector<1x80x4xbf16> to vector<80x4xbf16>
    %c16 = arith.constant 16 : index
    %c0_19 = arith.constant 0 : index
    %23 = vector.load %arg2[%c16, %c0_19] : memref<36x8xbf16, #tpu.memory_space<vmem>>, vector<4x8xbf16>
    %cst_20 = arith.constant dense<0.000000e+00> : vector<80x8xf32>
    %24 = tpu.matmul %22, %23, %cst_20 {dimension_numbers = #tpu.dot_dimension_numbers<[1], [0], [0], [1], [0, 0, 1, 1], [], []>} : vector<80x4xbf16>, vector<4x8xbf16>, vector<80x8xf32> -> vector<80x8xf32>
    %25 = arith.addf %20, %24 : vector<80x8xf32>
    %c0_21 = arith.constant 0 : index
    %c240 = arith.constant 240 : index
    %c0_22 = arith.constant 0 : index
    %26 = vector.load %arg1[%c0_21, %c240, %c0_22] : memref<1x464x4xbf16, #tpu.memory_space<vmem>>, vector<1x80x4xbf16>
    %27 = vector.shape_cast %26 : vector<1x80x4xbf16> to vector<80x4xbf16>
    %c20 = arith.constant 20 : index
    %c0_23 = arith.constant 0 : index
    %28 = vector.load %arg2[%c20, %c0_23] : memref<36x8xbf16, #tpu.memory_space<vmem>>, vector<4x8xbf16>
    %cst_24 = arith.constant dense<0.000000e+00> : vector<80x8xf32>
    %29 = tpu.matmul %27, %28, %cst_24 {dimension_numbers = #tpu.dot_dimension_numbers<[1], [0], [0], [1], [0, 0, 1, 1], [], []>} : vector<80x4xbf16>, vector<4x8xbf16>, vector<80x8xf32> -> vector<80x8xf32>
    %30 = arith.addf %25, %29 : vector<80x8xf32>
    %c0_25 = arith.constant 0 : index
    %c17 = arith.constant 17 : index
    %c0_26 = arith.constant 0 : index
    %31 = vector.load %arg1[%c0_25, %c17, %c0_26] : memref<1x464x4xbf16, #tpu.memory_space<vmem>>, vector<1x80x4xbf16>
    %32 = vector.shape_cast %31 : vector<1x80x4xbf16> to vector<80x4xbf16>
    %c24 = arith.constant 24 : index
    %c0_27 = arith.constant 0 : index
    %33 = vector.load %arg2[%c24, %c0_27] : memref<36x8xbf16, #tpu.memory_space<vmem>>, vector<4x8xbf16>
    %cst_28 = arith.constant dense<0.000000e+00> : vector<80x8xf32>
    %34 = tpu.matmul %32, %33, %cst_28 {dimension_numbers = #tpu.dot_dimension_numbers<[1], [0], [0], [1], [0, 0, 1, 1], [], []>} : vector<80x4xbf16>, vector<4x8xbf16>, vector<80x8xf32> -> vector<80x8xf32>
    %35 = arith.addf %30, %34 : vector<80x8xf32>
    %c0_29 = arith.constant 0 : index
    %c133 = arith.constant 133 : index
    %c0_30 = arith.constant 0 : index
    %36 = vector.load %arg1[%c0_29, %c133, %c0_30] : memref<1x464x4xbf16, #tpu.memory_space<vmem>>, vector<1x80x4xbf16>
    %37 = vector.shape_cast %36 : vector<1x80x4xbf16> to vector<80x4xbf16>
    %c28 = arith.constant 28 : index
    %c0_31 = arith.constant 0 : index
    %38 = vector.load %arg2[%c28, %c0_31] : memref<36x8xbf16, #tpu.memory_space<vmem>>, vector<4x8xbf16>
    %cst_32 = arith.constant dense<0.000000e+00> : vector<80x8xf32>
    %39 = tpu.matmul %37, %38, %cst_32 {dimension_numbers = #tpu.dot_dimension_numbers<[1], [0], [0], [1], [0, 0, 1, 1], [], []>} : vector<80x4xbf16>, vector<4x8xbf16>, vector<80x8xf32> -> vector<80x8xf32>
    %40 = arith.addf %35, %39 : vector<80x8xf32>
    %c0_33 = arith.constant 0 : index
    %c18 = arith.constant 18 : index
    %c0_34 = arith.constant 0 : index
    %41 = vector.load %arg1[%c0_33, %c18, %c0_34] : memref<1x464x4xbf16, #tpu.memory_space<vmem>>, vector<1x80x4xbf16>
    %42 = vector.shape_cast %41 : vector<1x80x4xbf16> to vector<80x4xbf16>
    %c32 = arith.constant 32 : index
    %c0_35 = arith.constant 0 : index
    %43 = vector.load %arg2[%c32, %c0_35] : memref<36x8xbf16, #tpu.memory_space<vmem>>, vector<4x8xbf16>
    %cst_36 = arith.constant dense<0.000000e+00> : vector<80x8xf32>
    %44 = tpu.matmul %42, %43, %cst_36 {dimension_numbers = #tpu.dot_dimension_numbers<[1], [0], [0], [1], [0, 0, 1, 1], [], []>} : vector<80x4xbf16>, vector<4x8xbf16>, vector<80x8xf32> -> vector<80x8xf32>
    %45 = arith.addf %40, %44 : vector<80x8xf32>
    %c0_37 = arith.constant 0 : index
    %c0_38 = arith.constant 0 : index
    %46 = vector.load %arg3[%c0_37, %c0_38] : memref<1x8xf32, #tpu.memory_space<vmem>>, vector<1x8xf32>
    %47 = vector.broadcast %46 : vector<1x8xf32> to vector<80x8xf32>
    %48 = arith.addf %45, %47 : vector<80x8xf32>
    %c0_39 = arith.constant 0 : index
    %c0_40 = arith.constant 0 : index
    %49 = vector.load %arg6[%c0_39, %c0_40] : memref<80x1xf32, #tpu.memory_space<vmem>>, vector<80x1xf32>
    %50 = vector.broadcast %49 : vector<80x1xf32> to vector<80x8xf32>
    %51 = arith.mulf %48, %50 : vector<80x8xf32>
    %cst_41 = arith.constant 0.000000e+00 : bf16
    %52 = vector.broadcast %cst_41 : bf16 to vector<116x8xbf16>
    %c0_42 = arith.constant 0 : index
    %c0_43 = arith.constant 0 : index
    %53 = vector.load %arg10[%c0_42, %c0_43] : memref<116x8xbf16, #tpu.memory_space<vmem>>, vector<116x8xbf16>
    tpu.vector_store %arg10[%c0_42, %c0_43], %52 {strides = array<i32>} : memref<116x8xbf16, #tpu.memory_space<vmem>>, vector<116x8xbf16>,
    %54 = arith.truncf %51 : vector<80x8xf32> to vector<80x8xbf16>
    %c18_44 = arith.constant 18 : index
    %c0_45 = arith.constant 0 : index
    %55 = vector.load %arg10[%c18_44, %c0_45] : memref<116x8xbf16, #tpu.memory_space<vmem>>, vector<80x8xbf16>
    tpu.vector_store %arg10[%c18_44, %c0_45], %54 {strides = array<i32>} : memref<116x8xbf16, #tpu.memory_space<vmem>>, vector<80x8xbf16>,
    %cst_46 = arith.constant 0.000000e+00 : f32
    %56 = vector.broadcast %cst_46 : f32 to vector<80x8xf32>
    %c7_47 = arith.constant 7 : index
    %c0_48 = arith.constant 0 : index
    %57 = vector.load %arg10[%c7_47, %c0_48] : memref<116x8xbf16, #tpu.memory_space<vmem>>, vector<80x8xbf16>
    %c0_49 = arith.constant 0 : index
    %c0_50 = arith.constant 0 : index
    %58 = vector.load %arg4[%c0_49, %c0_50] : memref<72x8xbf16, #tpu.memory_space<vmem>>, vector<8x8xbf16>
    %cst_51 = arith.constant dense<0.000000e+00> : vector<80x8xf32>
    %59 = tpu.matmul %57, %58, %cst_51 {dimension_numbers = #tpu.dot_dimension_numbers<[1], [0], [0], [1], [0, 0, 1, 1], [], []>} : vector<80x8xbf16>, vector<8x8xbf16>, vector<80x8xf32> -> vector<80x8xf32>
    %60 = arith.addf %56, %59 : vector<80x8xf32>
    %c8_52 = arith.constant 8 : index
    %c0_53 = arith.constant 0 : index
    %61 = vector.load %arg10[%c8_52, %c0_53] : memref<116x8xbf16, #tpu.memory_space<vmem>>, vector<80x8xbf16>
    %c8_54 = arith.constant 8 : index
    %c0_55 = arith.constant 0 : index
    %62 = vector.load %arg4[%c8_54, %c0_55] : memref<72x8xbf16, #tpu.memory_space<vmem>>, vector<8x8xbf16>
    %cst_56 = arith.constant dense<0.000000e+00> : vector<80x8xf32>
    %63 = tpu.matmul %61, %62, %cst_56 {dimension_numbers = #tpu.dot_dimension_numbers<[1], [0], [0], [1], [0, 0, 1, 1], [], []>} : vector<80x8xbf16>, vector<8x8xbf16>, vector<80x8xf32> -> vector<80x8xf32>
    %64 = arith.addf %60, %63 : vector<80x8xf32>
    %c9 = arith.constant 9 : index
    %c0_57 = arith.constant 0 : index
    %65 = vector.load %arg10[%c9, %c0_57] : memref<116x8xbf16, #tpu.memory_space<vmem>>, vector<80x8xbf16>
    %c16_58 = arith.constant 16 : index
    %c0_59 = arith.constant 0 : index
    %66 = vector.load %arg4[%c16_58, %c0_59] : memref<72x8xbf16, #tpu.memory_space<vmem>>, vector<8x8xbf16>
    %cst_60 = arith.constant dense<0.000000e+00> : vector<80x8xf32>
    %67 = tpu.matmul %65, %66, %cst_60 {dimension_numbers = #tpu.dot_dimension_numbers<[1], [0], [0], [1], [0, 0, 1, 1], [], []>} : vector<80x8xbf16>, vector<8x8xbf16>, vector<80x8xf32> -> vector<80x8xf32>
    %68 = arith.addf %64, %67 : vector<80x8xf32>
    %c17_61 = arith.constant 17 : index
    %c0_62 = arith.constant 0 : index
    %69 = vector.load %arg10[%c17_61, %c0_62] : memref<116x8xbf16, #tpu.memory_space<vmem>>, vector<80x8xbf16>
    %c24_63 = arith.constant 24 : index
    %c0_64 = arith.constant 0 : index
    %70 = vector.load %arg4[%c24_63, %c0_64] : memref<72x8xbf16, #tpu.memory_space<vmem>>, vector<8x8xbf16>
    %cst_65 = arith.constant dense<0.000000e+00> : vector<80x8xf32>
    %71 = tpu.matmul %69, %70, %cst_65 {dimension_numbers = #tpu.dot_dimension_numbers<[1], [0], [0], [1], [0, 0, 1, 1], [], []>} : vector<80x8xbf16>, vector<8x8xbf16>, vector<80x8xf32> -> vector<80x8xf32>
    %72 = arith.addf %68, %71 : vector<80x8xf32>
    %c18_66 = arith.constant 18 : index
    %c0_67 = arith.constant 0 : index
    %73 = vector.load %arg10[%c18_66, %c0_67] : memref<116x8xbf16, #tpu.memory_space<vmem>>, vector<80x8xbf16>
    %c32_68 = arith.constant 32 : index
    %c0_69 = arith.constant 0 : index
    %74 = vector.load %arg4[%c32_68, %c0_69] : memref<72x8xbf16, #tpu.memory_space<vmem>>, vector<8x8xbf16>
    %cst_70 = arith.constant dense<0.000000e+00> : vector<80x8xf32>
    %75 = tpu.matmul %73, %74, %cst_70 {dimension_numbers = #tpu.dot_dimension_numbers<[1], [0], [0], [1], [0, 0, 1, 1], [], []>} : vector<80x8xbf16>, vector<8x8xbf16>, vector<80x8xf32> -> vector<80x8xf32>
    %76 = arith.addf %72, %75 : vector<80x8xf32>
    %c19 = arith.constant 19 : index
    %c0_71 = arith.constant 0 : index
    %77 = vector.load %arg10[%c19, %c0_71] : memref<116x8xbf16, #tpu.memory_space<vmem>>, vector<80x8xbf16>
    %c40 = arith.constant 40 : index
    %c0_72 = arith.constant 0 : index
    %78 = vector.load %arg4[%c40, %c0_72] : memref<72x8xbf16, #tpu.memory_space<vmem>>, vector<8x8xbf16>
    %cst_73 = arith.constant dense<0.000000e+00> : vector<80x8xf32>
    %79 = tpu.matmul %77, %78, %cst_73 {dimension_numbers = #tpu.dot_dimension_numbers<[1], [0], [0], [1], [0, 0, 1, 1], [], []>} : vector<80x8xbf16>, vector<8x8xbf16>, vector<80x8xf32> -> vector<80x8xf32>
    %80 = arith.addf %76, %79 : vector<80x8xf32>
    %c27 = arith.constant 27 : index
    %c0_74 = arith.constant 0 : index
    %81 = vector.load %arg10[%c27, %c0_74] : memref<116x8xbf16, #tpu.memory_space<vmem>>, vector<80x8xbf16>
    %c48 = arith.constant 48 : index
    %c0_75 = arith.constant 0 : index
    %82 = vector.load %arg4[%c48, %c0_75] : memref<72x8xbf16, #tpu.memory_space<vmem>>, vector<8x8xbf16>
    %cst_76 = arith.constant dense<0.000000e+00> : vector<80x8xf32>
    %83 = tpu.matmul %81, %82, %cst_76 {dimension_numbers = #tpu.dot_dimension_numbers<[1], [0], [0], [1], [0, 0, 1, 1], [], []>} : vector<80x8xbf16>, vector<8x8xbf16>, vector<80x8xf32> -> vector<80x8xf32>
    %84 = arith.addf %80, %83 : vector<80x8xf32>
    %c28_77 = arith.constant 28 : index
    %c0_78 = arith.constant 0 : index
    %85 = vector.load %arg10[%c28_77, %c0_78] : memref<116x8xbf16, #tpu.memory_space<vmem>>, vector<80x8xbf16>
    %c56 = arith.constant 56 : index
    %c0_79 = arith.constant 0 : index
    %86 = vector.load %arg4[%c56, %c0_79] : memref<72x8xbf16, #tpu.memory_space<vmem>>, vector<8x8xbf16>
    %cst_80 = arith.constant dense<0.000000e+00> : vector<80x8xf32>
    %87 = tpu.matmul %85, %86, %cst_80 {dimension_numbers = #tpu.dot_dimension_numbers<[1], [0], [0], [1], [0, 0, 1, 1], [], []>} : vector<80x8xbf16>, vector<8x8xbf16>, vector<80x8xf32> -> vector<80x8xf32>
    %88 = arith.addf %84, %87 : vector<80x8xf32>
    %c29 = arith.constant 29 : index
    %c0_81 = arith.constant 0 : index
    %89 = vector.load %arg10[%c29, %c0_81] : memref<116x8xbf16, #tpu.memory_space<vmem>>, vector<80x8xbf16>
    %c64 = arith.constant 64 : index
    %c0_82 = arith.constant 0 : index
    %90 = vector.load %arg4[%c64, %c0_82] : memref<72x8xbf16, #tpu.memory_space<vmem>>, vector<8x8xbf16>
    %cst_83 = arith.constant dense<0.000000e+00> : vector<80x8xf32>
    %91 = tpu.matmul %89, %90, %cst_83 {dimension_numbers = #tpu.dot_dimension_numbers<[1], [0], [0], [1], [0, 0, 1, 1], [], []>} : vector<80x8xbf16>, vector<8x8xbf16>, vector<80x8xf32> -> vector<80x8xf32>
    %92 = arith.addf %88, %91 : vector<80x8xf32>
    %c0_84 = arith.constant 0 : index
    %c0_85 = arith.constant 0 : index
    %c0_86 = arith.constant 0 : index
    %93 = vector.load %arg7[%c0_84, %c0_85, %c0_86] : memref<1x80x4xf32, #tpu.memory_space<vmem>>, vector<1x80x4xf32>
    %94 = vector.shape_cast %93 : vector<1x80x4xf32> to vector<80x4xf32>
    %c0_87 = arith.constant 0 : index
    %c0_88 = arith.constant 0 : index
    %95 = vector.load %arg8[%c0_87, %c0_88] : memref<4x8xf32, #tpu.memory_space<vmem>>, vector<4x8xf32>
    %cst_89 = arith.constant dense<0.000000e+00> : vector<80x8xf32>
    %96 = tpu.matmul %94, %95, %cst_89 {dimension_numbers = #tpu.dot_dimension_numbers<[1], [0], [0], [1], [0, 0, 1, 1], [], []>} : vector<80x4xf32>, vector<4x8xf32>, vector<80x8xf32> -> vector<80x8xf32>
    %c0_90 = arith.constant 0 : index
    %c0_91 = arith.constant 0 : index
    %97 = vector.load %arg5[%c0_90, %c0_91] : memref<1x8xf32, #tpu.memory_space<vmem>>, vector<1x8xf32>
    %98 = vector.broadcast %97 : vector<1x8xf32> to vector<80x8xf32>
    %99 = arith.addf %92, %98 : vector<80x8xf32>
    %100 = arith.addf %99, %96 : vector<80x8xf32>
    %cst_92 = arith.constant 0.000000e+00 : f32
    %101 = vector.broadcast %cst_92 : f32 to vector<80x8xf32>
    %102 = arith.maximumf %100, %101 : vector<80x8xf32>
    %c0_93 = arith.constant 0 : index
    %c0_94 = arith.constant 0 : index
    %c0_95 = arith.constant 0 : index
    %103 = vector.load %arg9[%c0_93, %c0_94, %c0_95] : memref<1x80x8xf32, #tpu.memory_space<vmem>>, vector<1x80x8xf32>
    %104 = vector.shape_cast %103 : vector<1x80x8xf32> to vector<80x8xf32>
    %105 = vector.shape_cast %102 : vector<80x8xf32> to vector<1x80x8xf32>
    tpu.vector_store %arg9[%c0_93, %c0_94, %c0_95], %105 {strides = array<i32>} : memref<1x80x8xf32, #tpu.memory_space<vmem>>, vector<1x80x8xf32>,
    return
  }
  func.func @transform_0(%arg0: i32) -> (i32, i32, i32) {
    %c0_i32 = arith.constant 0 : i32
    %c0_i32_0 = arith.constant 0 : i32
    %c0_i32_1 = arith.constant 0 : i32
    return %arg0, %c0_i32, %c0_i32_0 : i32, i32, i32
  }
  func.func @transform_1(%arg0: i32) -> (i32, i32) {
    %c0_i32 = arith.constant 0 : i32
    %c0_i32_0 = arith.constant 0 : i32
    %c0_i32_1 = arith.constant 0 : i32
    return %c0_i32, %c0_i32_0 : i32, i32
  }
  func.func @transform_2(%arg0: i32) -> (i32, i32) {
    %c0_i32 = arith.constant 0 : i32
    %c0_i32_0 = arith.constant 0 : i32
    %c0_i32_1 = arith.constant 0 : i32
    return %c0_i32, %c0_i32_0 : i32, i32
  }
  func.func @transform_3(%arg0: i32) -> (i32, i32) {
    %c0_i32 = arith.constant 0 : i32
    %c0_i32_0 = arith.constant 0 : i32
    %c0_i32_1 = arith.constant 0 : i32
    return %c0_i32, %c0_i32_0 : i32, i32
  }
  func.func @transform_4(%arg0: i32) -> (i32, i32) {
    %c0_i32 = arith.constant 0 : i32
    %c0_i32_0 = arith.constant 0 : i32
    %c0_i32_1 = arith.constant 0 : i32
    return %c0_i32, %c0_i32_0 : i32, i32
  }
  func.func @transform_5(%arg0: i32) -> (i32, i32) {
    %c0_i32 = arith.constant 0 : i32
    %c0_i32_0 = arith.constant 0 : i32
    %c0_i32_1 = arith.constant 0 : i32
    return %c0_i32, %c0_i32_0 : i32, i32
  }
  func.func @transform_6(%arg0: i32) -> (i32, i32, i32) {
    %c0_i32 = arith.constant 0 : i32
    %c0_i32_0 = arith.constant 0 : i32
    %c0_i32_1 = arith.constant 0 : i32
    return %arg0, %c0_i32, %c0_i32_0 : i32, i32, i32
  }
  func.func @transform_7(%arg0: i32) -> (i32, i32) {
    %c0_i32 = arith.constant 0 : i32
    %c0_i32_0 = arith.constant 0 : i32
    %c0_i32_1 = arith.constant 0 : i32
    return %c0_i32, %c0_i32_0 : i32, i32
  }
  func.func @transform_8(%arg0: i32) -> (i32, i32, i32) {
    %c0_i32 = arith.constant 0 : i32
    %c0_i32_0 = arith.constant 0 : i32
    %c0_i32_1 = arith.constant 0 : i32
    return %arg0, %c0_i32, %c0_i32_0 : i32, i32, i32
  }
}

</mosaic_0001>

<bundles_post_ra>
// kernel: basic_block_forward.1
= control target key start
LH: loop header
LB: loop body
LE: loop exit
PB: predicated region body
PF: predicated region fallthrough
CT: control target
= control target key end

     0   :  { %s3353_s27 = smov 0   ;;  %s4237_s0 = inlined_call_operand.vmem [shape: bf16[2,464,4], index: 0, kind: input, shape index: {}]   ;;  %s4238_s1 = inlined_call_operand.vmem [shape: bf16[36,8], index: 1, kind: input, shape index: {}]   ;;  %s4239_s2 = inlined_call_operand.vmem [shape: f32[1,8], index: 2, kind: input, shape index: {}]   ;;  %s4240_s3 = inlined_call_operand.vmem [shape: bf16[72,8], index: 3, kind: input, shape index: {}]   ;;  %s4241_s4 = inlined_call_operand.vmem [shape: f32[1,8], index: 4, kind: input, shape index: {}]   ;;  %s4242_s5 = inlined_call_operand.vmem [shape: f32[80,1], index: 5, kind: input, shape index: {}]   ;;  %s4243_s6 = inlined_call_operand.vmem [shape: f32[2,80,4], index: 6, kind: input, shape index: {}]   ;;  %s4244_s7 = inlined_call_operand.vmem [shape: f32[4,8], index: 7, kind: input, shape index: {}]   ;;  %s4245_s8 = inlined_call_operand.vmem [shape: f32[2,80,8], index: 8, kind: output, shape index: {}]  }
   0x1 LB: > { %s2853_s28 = sadd.s32 4294967295, %s3305_s27   ;;  %p2857_p0 = scmp.ge.s32.totalorder %s3305_s27, 1  ;;  %s3305_s27 = sphi %s3353_s27, %s18_s27  }
   0x2   : > { %p272_p1 = scmp.lt.s32.totalorder %s3305_s27, 3 }
   0x4   : > { %p273_p2 = pnand %p2857_p0, %p272_p1 }
   0x5   : > { %p311_p3 = scmp.lt.s32.totalorder (!%p273_p2), %s2853_s28, 1 }
   0x6   : > { %276 = sbr.rel (%p273_p2) target bundleno = 706 (0x2c2), region = 52 }
   0xb   : > { %v350_v0 = vld [vmem:[%s4238_s1] sm:$0xc]  ;;  %vm453_vm0 = vcmask 1041408   ;;  %v625_v1 = vld [vmem:[%s4238_s1 + $0x4] sm:$0x3]  ;;  %s4249_s28 = smov (!%p311_p3, %s2853_s28), 1 }
   0xc   : > { %v434_v2 = vunpack.c.l.b16 %v350_v0  ;;  %v3368_v3 = vsel %vm453_vm0, %v625_v1, 0  ;;  %v704_v4 = vld [vmem:[%s4238_s1 + $0x4] sm:$0xc]  ;;  %v338_v6 = vld [vmem:[%s4238_s1] sm:$0x3]  ;;  %s3283_s15 = smul.u32 232, %s4249_s28 }
   0xd   : > { %3267 = vmatpush.bf16.msra.mxu2 %v3368_v3  ;;  %v787_v5 = vunpack.c.l.b16 %v704_v4  ;;  %v589_v8 = vsel %vm453_vm0, %v338_v6, 0  ;;  %vm379_vm1 = vsmask.f32 6400  ;;  %vm437_vm2 = vcmask 31744   ;;  %s3284_s11 = smul.u32 80, %s4249_s28 }
   0xe   : > { %v435_v7 = vpack.c.b16 %v434_v2, %v434_v2  ;;  %3266 = vmatpush.bf16.msra.mxu1 %v589_v8  ;;  %s3384_s18 = scalar_lea.vmem %s4237_s0, %s3283_s15  ;;  %vm519_vm3 = vsmask.f32 4352  ;;  %vm1119_vm4 = vsmask.f32 7424  ;;  %vm1391_vm5 = vcmask 1046528  }
   0xf   : > { %v788_v9 = vpack.c.b16 %v787_v5, %v787_v5  ;;  %v2863_v13 = vld [vmem:[%s3384_s18 + $0x3c] sm:$0xe]  ;;  %v3092_v14 = vld [vmem:[%s3384_s18 + $0x3c] sm:$0xf0]  ;;  %v3093_v15 = vld [vmem:[%s3384_s18 + $0x44] sm:$0xff]  ;;  %vm1696_vm7 = vcmask 1043456   ;;  %s4124_s14 = scalar_lea.vmem %s4243_s6, %s3284_s11  ;;  %s4198_s20 = scalar_lea.vmem %s4245_s8, %s3284_s11 }
  0x10   : > { %v436_v10 = vrot.slane %v435_v7, 2  ;;  %v2864_v16 = vor.u32 %v3092_v14, %v2863_v13  ;;  %v3094_v17 = vld [vmem:[%s3384_s18 + $0x4c] sm:$0xff]  ;;  %v389_v21 = vshrl.u32 %v3093_v15, 16  ;;  %v392_v22 = vshll.u32 %v3093_v15, 16  ;;  %v327_v37 = vld [vmem:[%s3384_s18] sm:$0x8] }
  0x11   : > { %v789_v11 = vrot.slane %v788_v9, 2  ;;  %v3222_v19 = vld [vmem:[%s3384_s18 + $0xc] sm:$0xff]   ;;  %v398_v26 = vshrl.u32 %v3094_v17, 16  ;;  %v401_v27 = vshll.u32 %v3094_v17, 16  ;;  %v3095_v44 = vld [vmem:[%s3384_s18 + $0x54] sm:$0xff]  ;;  %v502_v49 = vunpack.c.l.b16 %v327_v37  ;;  %v3187_v13 = vld [vmem:[%s3384_s18 + $0x20] sm:$0xff]  }
  0x12   : > { %v455_v12 = vsel %vm453_vm0, %v436_v10, 0  ;;  %v3394_v20 = vld [vmem:[%s3384_s18 + $0x8] sm:$0xff]   ;;  %v381_v24 = vshrl.u32 %v2864_v16, 16  ;;  %v384_v25 = vshll.u32 %v2864_v16, 16  ;;  %2892 = vmatmul.msk.bf16.vlgmr.msra.gmra.mxu2 %vm437_vm2, %v3222_v19  ;;  %v3185_v28 = vld [vmem:[%s3384_s18 + $0x10] sm:$0xff]   ;;  %v391_v29 = vrot.slane %v389_v21, 1 }
  0x13   : > { %464 = vmatpush.bf16.msra.mxu0 %v455_v12  ;;  %3265 = vmatpush.bf16.msra.mxu3 %v455_v12  ;;  %v806_v18 = vsel %vm453_vm0, %v789_v11, 0  ;;  %v529_v23 = vshrl.u32 %v3394_v20, 16  ;;  %v394_v30 = vrot.slane %v392_v22, 2  ;;  %v532_v32 = vshll.u32 %v3394_v20, 16  ;;  %v3407_v45 = vld [vmem:[%s3384_s18 + $0x4] sm:$0xf] }
  0x14   : > { %v383_v33 = vrot.slane %v381_v24, 1  ;;  %v386_v34 = vrot.slane %v384_v25, 2  ;;  %v400_v35 = vrot.slane %v398_v26, 1  ;;  %v403_v36 = vrot.slane %v401_v27, 2  ;;  %v3186_v56 = vld [vmem:[%s3384_s18 + $0x18] sm:$0xff]  }
  0x15   : > { %v531_v31 = vrot.slane %v529_v23, 3  ;;  %v395_v38 = vor.u32 %v394_v30, %v391_v29  ;;  %v534_v39 = vrot.slane %v532_v32, 4  ;;  %v538_v40 = vshrl.u32 %v3185_v28, 16  ;;  %v3224_v1 = vld [vmem:[%s3384_s18 + $0x14] sm:$0xff]   ;;  %v3096_v11 = vld [vmem:[%s3384_s18 + $0x5c] sm:$0xff] }
  0x16   : > { %v541_v41 = vshll.u32 %v3185_v28, 16  ;;  %v387_v42 = vor.u32 %v386_v34, %v383_v33  ;;  %v404_v43 = vor.u32 %v403_v36, %v400_v35  ;;  %v503_v53 = vunpack.c.l.b16 %v3407_v45  ;;  %v349_v19 = vld [vmem:[%s3384_s18 + $0x64] sm:$0x3]  ;;  %v3225_v25 = vld [vmem:[%s3384_s18 + $0x1c] sm:$0xff]   ;;  %v337_v30 = vld [vmem:[%s3384_s18 + $0x28] sm:$0xf] }
  0x17   : > { %815 = vmatpush.bf16.msrb.mxu3 %v806_v18  ;;  %598 = vmatpush.bf16.msrb.mxu0 %v589_v8  ;;  %v535_v46 = vor.u32 %v534_v39, %v531_v31  ;;  %v540_v47 = vrot.slane %v538_v40, 3  ;;  %v407_v54 = vshrl.u32 %v3095_v44, 16  ;;  %v410_v55 = vshll.u32 %v3095_v44, 16  ;;  %v863_v18 = vld [vmem:[%s4238_s1 + $0x8] sm:$0x3]  ;;  %v3098_v39 = vld [vmem:[%s3384_s18 + $0xb8] sm:$0xff] }
  0x18   : > { %v543_v48 = vrot.slane %v541_v41, 4  ;;  %v396_v50 = vsel %vm379_vm1, %v387_v42, %v395_v38  ;;  %v405_v51 = vsel %vm379_vm1, %v395_v38, %v404_v43  ;;  %v513_v58 = vpack.c.b16 %v503_v53, %v502_v49  ;;  %v2903_v33 = vld [vmem:[%s3384_s18 + $0xb0] sm:$0xe]  ;;  %v3097_v34 = vld [vmem:[%s3384_s18 + $0xb0] sm:$0xf0] }
  0x19   : > { %2881 = vmatmul.msk.bf16.vlgmr.msra.gmra.mxu0 %vm437_vm2, %v396_v50  ;;  %2882 = vmatmul.msk.bf16.vlgmr.msra.gmra.mxu3 %vm437_vm2, %v405_v51  ;;  %v547_v61 = vshrl.u32 %v3186_v56, 16  ;;  %v550_v62 = vshll.u32 %v3186_v56, 16  ;;  %v409_v63 = vrot.slane %v407_v54, 1  ;;  %v412_v0 = vrot.slane %v410_v55, 2  ;;  %v1237_v50 = vld [vmem:[%s4238_s1 + $0xc] sm:$0xc] }
  0x1a   : > { %v544_v52 = vor.u32 %v543_v48, %v540_v47  ;;  %v521_v59 = vshrl.u32 %v513_v58, 16  ;;  %v524_v60 = vshll.u32 %v513_v58, 16  ;;  %v416_v14 = vshrl.u32 %v3096_v11, 16  ;;  %v1090_v51 = vld [vmem:[%s4238_s1 + $0xc] sm:$0x3] }
  0x1b   : > { %656 = vmatpush.bf16.msra.mxu0 %v3368_v3  ;;  %v549_v5 = vrot.slane %v547_v61, 3  ;;  %v552_v6 = vrot.slane %v550_v62, 4  ;;  %v413_v7 = vor.u32 %v412_v0, %v409_v63  ;;  %v419_v15 = vshll.u32 %v3096_v11, 16 }
  0x1c   : > { %v545_v57 = vsel %vm519_vm3, %v535_v46, %v544_v52  ;;  %v523_v2 = vrot.slane %v521_v59, 3  ;;  %v526_v4 = vrot.slane %v524_v60, 4  ;;  %v556_v16 = vshrl.u32 %v3187_v13, 16 }
  0x1d   : > { %2887 = vmatmul.msk.bf16.vlgmr.msra.gmra.mxu1 %vm437_vm2, %v545_v57  ;;  %v553_v8 = vor.u32 %v552_v6, %v549_v5  ;;  %v414_v9 = vsel %vm379_vm1, %v404_v43, %v413_v7  ;;  %v559_v17 = vshll.u32 %v3187_v13, 16  ;;  %v961_v21 = vsel %vm453_vm0, %v863_v18, 0  ;;  %v1387_v57 = vld [vmem:[%s4238_s1 + $0x10] sm:$0x3] }
  0x1e   : > { %v527_v3 = vor.u32 %v526_v4, %v523_v2  ;;  %v418_v22 = vrot.slane %v416_v14, 1  ;;  %v421_v24 = vrot.slane %v419_v15, 2  ;;  %v558_v26 = vrot.slane %v556_v16, 3  ;;  %v3269_v14 = vld [vmem:[%s3384_s18 + $0x74] sm:$0xf0]  }
  0x1f   : > { %v554_v12 = vsel %vm519_vm3, %v544_v52, %v553_v8  ;;  %v561_v27 = vrot.slane %v559_v17, 4  ;;  %v372_v28 = vunpack.c.l.b16 %v349_v19  ;;  %v3126_v29 = vunpack.c.l.b16 %v3394_v20  ;;  %v3468_v17 = vld [vmem:[%s3384_s18 + $0x10] sm:$0xff] }
  0x20   : > { %v536_v10 = vsel %vm519_vm3, %v527_v3, %v535_v46  ;;  %v422_v31 = vor.u32 %v421_v24, %v418_v22  ;;  %v512_v37 = vunpack.c.l.b16 %v337_v30  ;;  %v2904_v41 = vor.u32 %v3097_v34, %v2903_v33  ;;  %v1007_v46 = vld [vmem:[%s4238_s1 + $0x8] sm:$0xc]  ;;  %v3271_v22 = vld [vmem:[%s3384_s18 + $0x7c] sm:$0xff]  }
  0x21   : > { %v3439_v35 = vor.u32 %v561_v27, %v558_v26  ;;  %v378_v36 = vpack.c.b16 %v372_v28, %v372_v28  ;;  %v626_v38 = vpack.c.b16 %v3126_v29, %v503_v53  ;;  %v3139_v47 = vunpack.c.h.b16 %v3187_v13  ;;  %v3228_v13 = vld [vmem:[%s3384_s18 + $0x74] sm:$0x8] }
  0x22   : > { %2893 = vmatmul.msk.bf16.gmra.mxu2 %vm437_vm2, %v3224_v1  ;;  %v423_v40 = vsel %vm379_vm1, %v413_v7, %v422_v31  ;;  %v518_v45 = vpack.c.b16 %v512_v37, %v512_v37  ;;  %v901_v48 = vshrl.u32 %v3098_v39, 16  ;;  %v904_v49 = vshll.u32 %v3098_v39, 16 }
  0x23   : > { %v563_v42 = vsel %vm519_vm3, %v553_v8, %v3439_v35  ;;  %v425_v43 = vshrl.u32 %v378_v36, 16  ;;  %v428_v44 = vshll.u32 %v378_v36, 16  ;;  %v1014_v52 = vunpack.c.l.b16 %v1007_v46 }
  0x24   : > { %v893_v53 = vshrl.u32 %v2904_v41, 16  ;;  %v896_v54 = vshll.u32 %v2904_v41, 16  ;;  %v1321_v55 = vunpack.c.l.b16 %v1237_v50  ;;  %v1180_v56 = vsel %vm453_vm0, %v1090_v51, 0 }
  0x25   : > { %1189 = vmatpush.bf16.msrb.mxu2 %v1180_v56  ;;  %v1015_v58 = vpack.c.b16 %v1014_v52, %v1014_v52  ;;  %v1419_v59 = vsel %vm453_vm0, %v1387_v57, 0  ;;  %v427_v60 = vrot.slane %v425_v43, 1  ;;  %v430_v61 = vrot.slane %v428_v44, 2  ;;  %v3203_v52 = vld [vmem:[%s3384_s18 + $0x78] sm:$0xff]  }
  0x26   : > { %v565_v62 = vshrl.u32 %v518_v45, 16  ;;  %v1322_v63 = vpack.c.b16 %v1321_v55, %v1321_v55  ;;  %v630_v0 = vpack.c.b16 %v512_v37, %v3139_v47  ;;  %v568_v1 = vshll.u32 %v518_v45, 16  ;;  %v3273_v47 = vld [vmem:[%s3384_s18 + $0x84] sm:$0xff]  }
  0x27   : > { %v903_v2 = vrot.slane %v901_v48, 1  ;;  %v1016_v4 = vrot.slane %v1015_v58, 2  ;;  %v895_v5 = vrot.slane %v893_v53, 1  ;;  %v898_v6 = vrot.slane %v896_v54, 2 }
  0x28   : > { %v906_v7 = vrot.slane %v904_v49, 2  ;;  %v1323_v3 = vrot.slane %v1322_v63, 2  ;;  %v570_v11 = vrot.slane %v568_v1, 4  ;;  %v3229_v19 = vor.u32 %v3269_v14, %v3228_v13  ;;  %v3100_v49 = vld [vmem:[%s3384_s18 + $0xc8] sm:$0xff] }
  0x29   : > { %2883 = vmatmul.msk.bf16.gmra.mxu3 %vm437_vm2, %v414_v9  ;;  %2886 = vmatmul.msk.bf16.vlgmr.msrb.gmra.mxu0 %vm437_vm2, %v536_v10  ;;  %v1033_v8 = vsel %vm453_vm0, %v1016_v4, 0  ;;  %v567_v10 = vrot.slane %v565_v62, 3  ;;  %v899_v15 = vor.u32 %v898_v6, %v895_v5  ;;  %v1125_v26 = vrot.slane %v532_v32, 1  ;;  %v3275_v5 = vld [vmem:[%s3384_s18 + $0x8c] sm:$0xff]  }
  0x2a   : > { %970 = vmatpush.bf16.msrb.mxu0 %v961_v21  ;;  %v1340_v9 = vsel %vm453_vm0, %v1323_v3, 0  ;;  %1042 = vmatpush.bf16.msrb.mxu1 %v1033_v8  ;;  %v907_v16 = vor.u32 %v906_v7, %v903_v2  ;;  %v1128_v27 = vshll.u32 %v3468_v17, 16  ;;  %v734_v29 = vshrl.u32 %v3229_v19, 16  ;;  %v3502_v2 = vld [vmem:[%s3384_s18 + $0x20] sm:$0xff]  ;;  %v3101_v7 = vld [vmem:[%s3384_s18 + $0xd0] sm:$0xff] }
  0x2b   : > { %1349 = vmatpush.bf16.msra.mxu3 %v1340_v9  ;;  %v571_v18 = vor.u32 %v570_v11, %v567_v10  ;;  %v737_v30 = vshll.u32 %v3229_v19, 16  ;;  %v742_v33 = vshrl.u32 %v3271_v22, 16  ;;  %v1126_v37 = vor.u32 %v1125_v26, %v529_v23  ;;  %v3487_v23 = vld [vmem:[%s3384_s18 + $0x18] sm:$0xff]  ;;  %v3204_v9 = vld [vmem:[%s3384_s18 + $0x80] sm:$0xff]  }
  0x2c   : > { %v908_v24 = vsel %vm379_vm1, %v899_v15, %v907_v16  ;;  %v1130_v32 = vrot.slane %v1128_v27, 1  ;;  %v1132_v50 = vshrl.u32 %v3468_v17, 16  ;;  %v1136_v51 = vshll.u32 %v3487_v23, 16 }
  0x2d   : > { %2888 = vmatmul.msk.bf16.gmra.mxu1 %vm437_vm2, %v554_v12  ;;  %v431_v12 = vor.u32 %v430_v61, %v427_v60  ;;  %v572_v28 = vsel %vm519_vm3, %v3439_v35, %v571_v18  ;;  %v739_v35 = vrot.slane %v737_v30, 4  ;;  %v744_v39 = vrot.slane %v742_v33, 3  ;;  %v3276_v30 = vld [vmem:[%s3384_s18 + $0x94] sm:$0xff]  }
  0x2e   : > { %v1131_v43 = vsel %vm1119_vm4, %v1126_v37, %v1130_v32  ;;  %v751_v53 = vshrl.u32 %v3273_v47, 16  ;;  %v754_v54 = vshll.u32 %v3273_v47, 16  ;;  %v919_v55 = vshrl.u32 %v3100_v49, 16  ;;  %v3205_v37 = vld [vmem:[%s3384_s18 + $0x88] sm:$0xff]   ;;  %v3207_v47 = vld [vmem:[%s3384_s18 + $0x98] sm:$0xff]  }
  0x2f   : > { %v432_v21 = vsel %vm379_vm1, %v422_v31, %v431_v12  ;;  %v745_v31 = vshll.u32 %v3271_v22, 16  ;;  %v922_v56 = vshll.u32 %v3100_v49, 16  ;;  %v1134_v57 = vor.u32 %v1132_v50, %v1130_v32 }
  0x30   : > { %v1138_v58 = vrot.slane %v1136_v51, 1  ;;  %v756_v60 = vrot.slane %v754_v54, 4  ;;  %v921_v61 = vrot.slane %v919_v55, 1  ;;  %v1140_v3 = vshrl.u32 %v3487_v23, 16 }
  0x31   : > { %v924_v62 = vrot.slane %v922_v56, 2  ;;  %v1144_v8 = vshll.u32 %v3502_v2, 16  ;;  %v760_v10 = vshrl.u32 %v3275_v5, 16  ;;  %v763_v11 = vshll.u32 %v3275_v5, 16 }
  0x32   : > { %2894 = vmatmul.msk.bf16.gmra.mxu2 %vm437_vm2, %v3225_v25  ;;  %v3099_v25 = vld [vmem:[%s3384_s18 + $0xc0] sm:$0xff]  ;;  %v1139_v63 = vsel %vm1119_vm4, %v1134_v57, %v1138_v58  ;;  %v928_v12 = vshrl.u32 %v3101_v7, 16  ;;  %v931_v13 = vshll.u32 %v3101_v7, 16  ;;  %v1142_v14 = vor.u32 %v1140_v3, %v1138_v58 }
  0x33   : > { %v910_v34 = vshrl.u32 %v3099_v25, 16  ;;  %v913_v36 = vshll.u32 %v3099_v25, 16  ;;  %v925_v1 = vor.u32 %v924_v62, %v921_v61  ;;  %v1146_v15 = vrot.slane %v1144_v8, 1  ;;  %v1480_v8 = vld [vmem:[%s4242_s5 + $0x8] sm:$0xff] }
  0x34   : > { %v765_v18 = vrot.slane %v763_v11, 4  ;;  %v930_v19 = vrot.slane %v928_v12, 1  ;;  %v769_v32 = vshrl.u32 %v3276_v30, 16  ;;  %v3159_v50 = vunpack.c.h.b16 %v3207_v47  ;;  %v2954_v12 = vld [vmem:[%s3384_s18 + $0x40] sm:$0xc] }
  0x35   : > { %v912_v41 = vrot.slane %v910_v34, 1  ;;  %v1147_v22 = vsel %vm1119_vm4, %v1142_v14, %v1146_v15  ;;  %v1148_v34 = vshrl.u32 %v3502_v2, 16  ;;  %v3307_v58 = vmov 0  }
  0x36   : > { %v732_v54 = vpack.c.b16 %v3159_v50, %v3159_v50  ;;  %3294 = vset.pattern.permute.xlu0 %v3307_v58  ;;  %3295 = vset.pattern.permute.xlu1 %v3307_v58  ;;  %v1393_v11 = vrot.slane %v3468_v17, 1  ;;  %vm1266_vm6 = vsmask.f32 5376  ;;  %v1482_v50 = vld [vmem:[%s4242_s5 + $0x18] sm:$0xff]  ;;  %vm1549_vm8 = vcmask 60416  }
  0x37   : > { %3296 = vset.pattern.permute.xlu2 %v3307_v58  ;;  %1552 = vst.msk [vmem:[#allocation2 + $0x8] sm:$0xf] %vm1549_vm8, %v3307_v58  ;;  %vm1629_vm9 = vcmask 60417   ;;  %vm1586_vm10 = vcmask 1040384   ;;  %vm1587_vm11 = vcmask 1044484   ;;  %vm1680_vm13 = vcmask 64512  }
  0x38   : > { %v778_v61 = vshrl.u32 %v732_v54, 16  ;;  %v781_v62 = vshll.u32 %v732_v54, 16  ;;  %1550 = vst.msk [vmem:[#allocation2] sm:$0xf] %vm1549_vm8, %v3307_v58  ;;  %vm3757_vm12 = vmor %vm1586_vm10, %vm1587_vm11  ;;  %vm1640_vm14 = vcmask 57344   ;;  %vm2477_vm15 = vcmask 1045504  }
  0x39   : > { %2884 = vmatmul.msk.bf16.gmra.mxu3 %vm437_vm2, %v423_v40  ;;  %2891 = vmatmul.msk.bf16.vlgmr.msra.gmra.mxu0 %vm437_vm2, %v626_v38  ;;  %v736_v38 = vrot.slane %v734_v29, 3  ;;  %v747_v40 = vrot.slane %v745_v31, 4  ;;  %1551 = vst.msk [vmem:[#allocation2 + $0x4] sm:$0xf] %vm1549_vm8, %v3307_v58 }
  0x3a   : > { %1428 = vmatpush.bf16.msra.mxu0 %v1419_v59  ;;  %v753_v59 = vrot.slane %v751_v53, 3  ;;  %v780_v5 = vrot.slane %v778_v61, 3  ;;  %1553 = vst.msk [vmem:[#allocation2 + $0xc] sm:$0xf] %vm1549_vm8, %v3307_v58 }
  0x3b   : > { %v740_v44 = vor.u32 %v739_v35, %v736_v38  ;;  %v748_v45 = vor.u32 %v747_v40, %v744_v39  ;;  %v772_v38 = vshll.u32 %v3276_v30, 16  ;;  %v1150_v40 = vor.u32 %v1148_v34, %v1146_v15  ;;  %1554 = vst.msk [vmem:[#allocation2 + $0x10] sm:$0xf] %vm1549_vm8, %v3307_v58 }
  0x3c   : > { %1555 = vst.msk [vmem:[#allocation2 + $0x14] sm:$0xf] %vm1549_vm8, %v3307_v58 }
  0x3d   : > { %2889 = vmatmul.msk.bf16.gmra.mxu1 %vm437_vm2, %v563_v42  ;;  %v915_v42 = vrot.slane %v913_v36, 2  ;;  %v749_v46 = vsel %vm519_vm3, %v740_v44, %v748_v45  ;;  %v774_v44 = vrot.slane %v772_v38, 4  ;;  %1556 = vst.msk [vmem:[#allocation2 + $0x18] sm:$0xf] %vm1549_vm8, %v3307_v58 }
  0x3e   : > { %1557 = vst.msk [vmem:[#allocation2 + $0x1c] sm:$0xf] %vm1549_vm8, %v3307_v58 }
  0x3f   : > { %v916_v20 = vor.u32 %v915_v42, %v912_v41  ;;  %v1089_v42 = vld [vmem:[%s3384_s18 + $0x30] sm:$0x1]  ;;  %1558 = vst.msk [vmem:[#allocation2 + $0x20] sm:$0xf] %vm1549_vm8, %v3307_v58 }
  0x40   : > { %1559 = vst.msk [vmem:[#allocation2 + $0x24] sm:$0xf] %vm1549_vm8, %v3307_v58 }
  0x41   : > { %v917_v48 = vsel %vm379_vm1, %v907_v16, %v916_v20  ;;  %v926_v6 = vsel %vm379_vm1, %v916_v20, %v925_v1  ;;  %v762_v16 = vrot.slane %v760_v10, 3  ;;  %1560 = vst.msk [vmem:[#allocation2 + $0x28] sm:$0xf] %vm1549_vm8, %v3307_v58 }
  0x42   : > { %2895 = vmatmul.msk.bf16.gmra.mxu2 %vm437_vm2, %v630_v0  ;;  %v757_v0 = vor.u32 %v756_v60, %v753_v59  ;;  %v1479_v59 = vld [vmem:[%s4242_s5] sm:$0xff]  ;;  %v3206_v60 = vld [vmem:[%s3384_s18 + $0x90] sm:$0xff]   ;;  %1561 = vst.msk [vmem:[#allocation2 + $0x2c] sm:$0xf] %vm1549_vm8, %v3307_v58 }
  0x43   : > { %v766_v25 = vor.u32 %v765_v18, %v762_v16  ;;  %1491 = vperm.xlu0 %3294, %v1479_v59   ;;  %v3107_v18 = vld [vmem:[%s3384_s18 + $0x48] sm:$0xff]  ;;  %1562 = vst.msk [vmem:[#allocation2 + $0x30] sm:$0xf] %vm1549_vm8, %v3307_v58 }
  0x44   : > { %v758_v4 = vsel %vm519_vm3, %v748_v45, %v757_v0  ;;  %1563 = vst.msk [vmem:[#allocation2 + $0x34] sm:$0xf] %vm1549_vm8, %v3307_v58  ;;  %v3726_v58 = vld [vmem:[%s4239_s2] ss:$0 sm:$0xff] }
  0x45   : > { %v767_v29 = vsel %vm519_vm3, %v757_v0, %v766_v25 }
  0x49   : > { %2885 = vmatmul.msk.bf16.gmra.mxu3 %vm437_vm2, %v432_v21  ;;  %2921 = vmatmul.msk.bf16.vlgmr.msrb.gmra.mxu0 %vm437_vm2, %v908_v24  ;;  %v933_v21 = vrot.slane %v931_v13, 2  ;;  %v862_v24 = vld [vmem:[%s3384_s18 + $0xd8] sm:$0x3]  ;;  %v3106_v13 = vld [vmem:[%s3384_s18 + $0x40] sm:$0xf0] }
  0x4a   : > { %v885_v27 = vunpack.c.l.b16 %v862_v24 }
  0x4b   : > { %v934_v26 = vor.u32 %v933_v21, %v930_v19  ;;  %1496 = vperm.xlu0 %3294, %v1480_v8   ;;  %v2955_v19 = vor.u32 %v3106_v13, %v2954_v12 }
  0x4c   : > { %v891_v31 = vpack.c.b16 %v885_v27, %v885_v27  ;;  %v1279_v27 = vshll.u32 %v3107_v18, 16 }
  0x4d   : > { %2890 = vmatmul.msk.bf16.gmra.mxu1 %vm437_vm2, %v572_v28  ;;  %v3518_v28 = vld [vmem:[%s3384_s18 + $0x28] sm:$0xff]  ;;  %v935_v33 = vsel %vm379_vm1, %v925_v1, %v934_v26  ;;  %v1268_v17 = vshrl.u32 %v2955_v19, 16 }
  0x4e   : > { %v1152_v36 = vshll.u32 %v3518_v28, 16  ;;  %v937_v35 = vshrl.u32 %v891_v31, 16  ;;  %v940_v39 = vshll.u32 %v891_v31, 16  ;;  %v1156_v56 = vshrl.u32 %v3518_v28, 16  ;;  %v3209_v1 = vld [vmem:[%s3384_s18 + $0x8] sm:$0xf0] }
  0x4f   : > { %v1270_v34 = vrot.slane %v1268_v17, 2 }
  0x50   : > { %v1154_v41 = vrot.slane %v1152_v36, 1  ;;  %v939_v45 = vrot.slane %v937_v35, 1  ;;  %v942_v20 = vrot.slane %v940_v39, 2  ;;  %v1481_v35 = vld [vmem:[%s4242_s5 + $0x10] sm:$0xff]  ;;  %v1488_v39 = vld [vmem:[%s4242_s5 + $0x48] sm:$0xff] }
  0x51   : > { %1501 = vperm.xlu1 %3295, %v1481_v35  }
  0x52   : > { %2947 = vmatmul.msk.bf16.vlgmr.msrb.gmra.mxu2 %vm437_vm2, %v1131_v43  ;;  %v771_v43 = vrot.slane %v769_v32, 3  ;;  %v943_v51 = vor.u32 %v942_v20, %v939_v45  ;;  %v1281_v32 = vrot.slane %v1279_v27, 3 }
  0x54   : > { %v775_v49 = vor.u32 %v774_v44, %v771_v43  ;;  %v944_v55 = vsel %vm379_vm1, %v934_v26, %v943_v51  ;;  %v1276_v26 = vshrl.u32 %v3107_v18, 16  ;;  %v1395_v43 = vrot.slane %v3487_v23, 1 }
  0x56   : > { %v776_v53 = vsel %vm519_vm3, %v766_v25, %v775_v49  ;;  %v1271_v25 = vshll.u32 %v2955_v19, 16 }
  0x58   : > { %v1273_v36 = vrot.slane %v1271_v25, 3  ;;  %v1483_v25 = vld [vmem:[%s4242_s5 + $0x20] sm:$0xff] }
  0x59   : > { %2896 = vmatmul.msk.bf16.vlgmr.msrb.gmra.mxu3 %vm437_vm2, %v749_v46  ;;  %2922 = vmatmul.msk.bf16.gmra.mxu0 %vm437_vm2, %v917_v48  ;;  %v1155_v46 = vsel %vm1119_vm4, %v1150_v40, %v1154_v41  ;;  %v1112_v48 = vunpack.c.l.b16 %v1089_v42 }
  0x5a   : > { %1506 = vperm.xlu1 %3295, %v1482_v50   ;;  %1511 = vperm.xlu2 %3296, %v1483_v25   ;;  %v1487_v50 = vld [vmem:[%s4242_s5 + $0x40] sm:$0xff] }
  0x5d   : > { %2926 = vmatmul.msk.bf16.vlgmr.msrb.gmra.mxu1 %vm437_vm2, %v3203_v52  ;;  %v3533_v52 = vpack.c.b16 %v1112_v48, %v1112_v48  ;;  %v1396_v48 = vsel %vm1391_vm5, %v1393_v11, %v1395_v43 }
  0x5f   : > { %v1160_v57 = vshll.u32 %v3533_v52, 16 }
  0x61   : > { %v1162_v0 = vrot.slane %v1160_v57, 1 }
  0x62   : > { %2948 = vmatmul.msk.bf16.gmra.mxu2 %vm437_vm2, %v1139_v63  ;;  %v1158_v63 = vor.u32 %v1156_v56, %v1154_v41  ;;  %v1274_v41 = vor.u32 %v1273_v36, %v1270_v34 }
  0x64   : > { %v1163_v3 = vsel %vm1119_vm4, %v1158_v63, %v1162_v0 }
  0x69   : > { %2897 = vmatmul.msk.bf16.gmra.mxu3 %vm437_vm2, %v758_v4  ;;  %2923 = vmatmul.msk.bf16.gmra.mxu0 %vm437_vm2, %v926_v6  ;;  %v3210_v4 = vld [vmem:[%s3384_s18 + $0x8] sm:$0xe]  ;;  %v783_v6 = vrot.slane %v781_v62, 4  ;;  %v1486_v62 = vld [vmem:[%s4242_s5 + $0x38] sm:$0xff] }
  0x6a   : > { %v3211_v7 = vor.u32 %v3210_v4, %v3209_v1  ;;  %1526 = vperm.xlu1 %3295, %v1486_v62   ;;  %v1397_v1 = vrot.slane %v3502_v2, 1 }
  0x6c   : > { %v1392_v10 = vrot.slane %v3211_v7, 1  ;;  %v3109_v7 = vld [vmem:[%s3384_s18 + $0x58] sm:$0xff] }
  0x6d   : > { %2927 = vmatmul.msk.bf16.gmra.mxu1 %vm437_vm2, %v3204_v9  ;;  %v784_v9 = vor.u32 %v783_v6, %v780_v5  ;;  %v1297_v12 = vshll.u32 %v3109_v7, 16 }
  0x6e   : > { %v1394_v21 = vsel %vm1391_vm5, %v1392_v10, %v1393_v11  ;;  %v1294_v11 = vshrl.u32 %v3109_v7, 16 }
  0x6f   : > { %v785_v16 = vsel %vm519_vm3, %v775_v49, %v784_v9 }
  0x72   : > { %2949 = vmatmul.msk.bf16.gmra.mxu2 %vm437_vm2, %v1147_v22  ;;  %v1485_v22 = vld [vmem:[%s4242_s5 + $0x30] sm:$0xff] }
  0x73   : > { %1521 = vperm.xlu0 %3294, %v1485_v22  }
  0x79   : > { %2898 = vmatmul.msk.bf16.gmra.mxu3 %vm437_vm2, %v767_v29  ;;  %2924 = vmatmul.msk.bf16.gmra.mxu0 %vm437_vm2, %v935_v33 }
  0x7b   : > { %1536 = vperm.xlu0 %3294, %v1488_v39   ;;  %v1484_v39 = vld [vmem:[%s4242_s5 + $0x28] sm:$0xff] }
  0x7c   : > { %1516 = vperm.xlu2 %3296, %v1484_v39  }
  0x7d   : > { %2928 = vmatmul.msk.bf16.gmra.mxu1 %vm437_vm2, %v3205_v37  ;;  %v1278_v37 = vrot.slane %v1276_v26, 2 }
  0x7f   : > { %v1282_v42 = vor.u32 %v1281_v32, %v1278_v37 }
  0x82   : > { %2950 = vmatmul.msk.bf16.gmra.mxu2 %vm437_vm2, %v1155_v46  ;;  %v1283_v46 = vsel %vm1266_vm6, %v1274_v41, %v1282_v42 }
  0x84   : > { %1531 = vperm.xlu2 %3296, %v1487_v50  }
  0x89   : > { %2899 = vmatmul.msk.bf16.gmra.mxu3 %vm437_vm2, %v776_v53  ;;  %2925 = vmatmul.msk.bf16.gmra.mxu0 %vm437_vm2, %v944_v55 }
  0x8d   : > { %2929 = vmatmul.msk.bf16.gmra.mxu1 %vm437_vm2, %v3206_v60 }
  0x92   : > { %2951 = vmatmul.msk.bf16.gmra.mxu2 %vm437_vm2, %v1163_v3  ;;  %v1398_v3 = vsel %vm1391_vm5, %v1395_v43, %v1397_v1 }
  0x95   : > { %v663_v14 = vpop.f32.mrf.mxu2 }
  0x96   : > { %v466_v15 = vpop.f32.mrf.mxu0 }
  0x99   : > { %2900 = vmatmul.msk.bf16.gmra.mxu3 %vm437_vm2, %v785_v16  ;;  %2977 = vmatmul.msk.bf16.vlgmr.msra.gmra.mxu0 %vm437_vm2, %v1394_v21  ;;  %v1299_v16 = vrot.slane %v1297_v12, 3 }
  0x9a   : > { %v605_v24 = vpop.f32.mrf.mxu1 }
  0x9c   : > { %v471_v29 = vpop.f32.mrf.mxu3 }
  0x9d   : > { %2930 = vmatmul.msk.bf16.gmra.mxu1 %vm437_vm2, %v3207_v47  ;;  %v606_v30 = vadd.f32 %v605_v24, %v471_v29  ;;  %v3568_v33 = vpop.f32.mrf.mxu2  ;;  %v3108_v47 = vld [vmem:[%s3384_s18 + $0x50] sm:$0xff]  ;;  %v1399_v24 = vrot.slane %v3518_v28, 1  ;;  %v3110_v29 = vld [vmem:[%s3384_s18 + $0x60] sm:$0xff] }
  0x9e   : > { %v3570_v31 = vpop.f32.mrf.mxu0  ;;  %v1285_v23 = vshrl.u32 %v3108_v47, 16  ;;  %v1288_v53 = vshll.u32 %v3108_v47, 16  ;;  %v1303_v28 = vshrl.u32 %v3110_v29, 16  ;;  %v1306_v36 = vshll.u32 %v3110_v29, 16 }
  0x9f   : > { %v3572_v38 = vadd.f32 %v663_v14, %v606_v30  ;;  %v1400_v30 = vsel %vm1391_vm5, %v1397_v1, %v1399_v24 }
  0xa0   : > { %v1287_v59 = vrot.slane %v1285_v23, 2  ;;  %v1290_v60 = vrot.slane %v1288_v53, 3  ;;  %v1305_v41 = vrot.slane %v1303_v28, 2 }
  0xa2   : > { %v3580_v40 = vpop.f32.mrf.mxu1  ;;  %v1291_v0 = vor.u32 %v1290_v60, %v1287_v59 }
  0xa4   : > { %v3583_v44 = vpop.f32.mrf.mxu3  ;;  %v1292_v6 = vsel %vm1266_vm6, %v1282_v42, %v1291_v0  ;;  %v1308_v42 = vrot.slane %v1306_v36, 3 }
  0xa5   : > { %v668_v45 = vpop.f32.mrf.mxu2 }
  0xa6   : > { %v600_v20 = vpop.f32.mrf.mxu0 }
  0xa7   : > { %v601_v49 = vadd.f32 %v600_v20, %v466_v15  ;;  %v1296_v15 = vrot.slane %v1294_v11, 2  ;;  %v1236_v20 = vld [vmem:[%s3384_s18 + $0x68] sm:$0x7] }
  0xa8   : > { %v1259_v47 = vunpack.c.l.b16 %v1236_v20 }
  0xa9   : > { %2972 = vmatmul.msk.bf16.vlgmr.msra.gmra.mxu3 %vm437_vm2, %v1283_v46  ;;  %2978 = vmatmul.msk.bf16.gmra.mxu0 %vm437_vm2, %v1396_v48  ;;  %v1300_v22 = vor.u32 %v1299_v16, %v1296_v15  ;;  %v1309_v46 = vor.u32 %v1308_v42, %v1305_v41  ;;  %v1401_v48 = vrot.slane %v3533_v52, 1 }
  0xaa   : > { %v610_v51 = vpop.f32.mrf.mxu1  ;;  %v1265_v53 = vpack.c.b16 %v1259_v47, %v1259_v47 }
  0xab   : > { %v1301_v26 = vsel %vm1266_vm6, %v1291_v0, %v1300_v22 }
  0xac   : > { %v476_v54 = vpop.f32.mrf.mxu3  ;;  %v1315_v59 = vshll.u32 %v1265_v53, 16 }
  0xad   : > { %v611_v55 = vadd.f32 %v610_v51, %v476_v54  ;;  %v3595_v57 = vpop.f32.mrf.mxu2  ;;  %v1310_v51 = vsel %vm1266_vm6, %v1300_v22, %v1309_v46  ;;  %v1402_v54 = vsel %vm1391_vm5, %v1399_v24, %v1401_v48 }
  0xae   : > { %v3593_v56 = vpop.f32.mrf.mxu0  ;;  %v1317_v0 = vrot.slane %v1315_v59, 3 }
  0xaf   : > { %v3597_v61 = vadd.f32 %v668_v45, %v611_v55  ;;  %v1312_v55 = vshrl.u32 %v1265_v53, 16 }
  0xb1   : > { %v1314_v62 = vrot.slane %v1312_v55, 2 }
  0xb2   : > { %v3602_v63 = vpop.f32.mrf.mxu1 }
  0xb3   : > { %v1318_v7 = vor.u32 %v1317_v0, %v1314_v62 }
  0xb4   : > { %v3605_v4 = vpop.f32.mrf.mxu3 }
  0xb5   : > { %v673_v9 = vpop.f32.mrf.mxu2  ;;  %v1319_v11 = vsel %vm1266_vm6, %v1309_v46, %v1318_v7 }
  0xb6   : > { %v658_v5 = vpop.f32.mrf.mxu0 }
  0xb7   : > { %v683_v8 = vadd.f32 %v658_v5, %v601_v49 }
  0xb9   : > { %2973 = vmatmul.msk.bf16.gmra.mxu3 %vm437_vm2, %v1292_v6  ;;  %2979 = vmatmul.msk.bf16.gmra.mxu0 %vm437_vm2, %v1398_v3  ;;  %v1653_v6 = vld [vmem:[%s4240_s3] sm:$0xf] }
  0xba   : > { %v615_v10 = vpop.f32.mrf.mxu1  ;;  %v1811_v3 = vsel %vm1696_vm7, %v1653_v6, 0 }
  0xbb   : > { %1820 = vmatpush.bf16.msra.mxu2 %v1811_v3 }
  0xbc   : > { %v481_v13 = vpop.f32.mrf.mxu3 }
  0xbd   : > { %v616_v2 = vadd.f32 %v615_v10, %v481_v13  ;;  %v3618_v21 = vpop.f32.mrf.mxu2 }
  0xbe   : > { %v3612_v14 = vpop.f32.mrf.mxu0 }
  0xbf   : > { %v3614_v18 = vadd.f32 %v673_v9, %v616_v2  ;;  %v1654_v9 = vld [vmem:[%s4240_s3 + $0x4] sm:$0xf] }
  0xc2   : > { %v3616_v19 = vpop.f32.mrf.mxu1 }
  0xc4   : > { %v3621_v17 = vpop.f32.mrf.mxu3 }
  0xc5   : > { %v678_v32 = vpop.f32.mrf.mxu2 }
  0xc6   : > { %v972_v27 = vpop.f32.mrf.mxu0 }
  0xc9   : > { %2974 = vmatmul.msk.bf16.gmra.mxu3 %vm437_vm2, %v1301_v26  ;;  %2980 = vmatmul.msk.bf16.gmra.mxu0 %vm437_vm2, %v1400_v30 }
  0xca   : > { %v620_v34 = vpop.f32.mrf.mxu1 }
  0xcc   : > { %v486_v37 = vpop.f32.mrf.mxu3 }
  0xcd   : > { %v621_v35 = vadd.f32 %v620_v34, %v486_v37  ;;  %v3678_v37 = vpop.f32.mrf.mxu2 }
  0xce   : > { %v3634_v43 = vpop.f32.mrf.mxu0 }
  0xcf   : > { %v3636_v45 = vadd.f32 %v678_v32, %v621_v35 }
  0xd2   : > { %v3675_v34 = vpop.f32.mrf.mxu1 }
  0xd4   : > { %v3640_v49 = vpop.f32.mrf.mxu3 }
  0xd5   : > { %v1191_v41 = vpop.f32.mrf.mxu2 }
  0xd6   : > { %v977_v23 = vpop.f32.mrf.mxu0 }
  0xd9   : > { %2975 = vmatmul.msk.bf16.gmra.mxu3 %vm437_vm2, %v1310_v51  ;;  %2981 = vmatmul.msk.bf16.gmra.mxu0 %vm437_vm2, %v1402_v54 }
  0xda   : > { %v1044_v35 = vpop.f32.mrf.mxu1 }
  0xdc   : > { %v817_v52 = vpop.f32.mrf.mxu3 }
  0xdd   : > { %v842_v60 = vadd.f32 %v817_v52, %v683_v8  ;;  %v1698_v8 = vsel %vm1696_vm7, %v1654_v9, 0  ;;  %v1193_v48 = vpop.f32.mrf.mxu2 }
  0xde   : > { %v3649_v1 = vpop.f32.mrf.mxu0  ;;  %1707 = vmatpush.bf16.msra.mxu1 %v1698_v8 }
  0xdf   : > { %v997_v5 = vadd.f32 %v972_v27, %v842_v60 }
  0xe1   : > { %v1069_v53 = vadd.f32 %v1044_v35, %v997_v5  ;;  %v1492_v5 = vpop.permute.xlu0 %1491 }
  0xe3   : > { %v1216_v52 = vadd.f32 %v1191_v41, %v1069_v53 }
  0xe4   : > { %v819_v10 = vpop.f32.mrf.mxu3 }
  0xe5   : > { %v1196_v59 = vpop.f32.mrf.mxu2 }
  0xe6   : > { %v982_v12 = vpop.f32.mrf.mxu0 }
  0xe9   : > { %2976 = vmatmul.msk.bf16.gmra.mxu3 %vm437_vm2, %v1319_v11 }
  0xec   : > { %v822_v13 = vpop.f32.mrf.mxu3 }
  0xed   : > { %v844_v2 = vadd.f32 %v822_v13, %v3572_v38 }
  0xee   : > { %v3662_v15 = vpop.f32.mrf.mxu0 }
  0xef   : > { %v3664_v16 = vadd.f32 %v977_v23, %v844_v2 }
  0xf4   : > { %v3666_v22 = vpop.f32.mrf.mxu3 }
  0xf6   : > { %v987_v24 = vpop.f32.mrf.mxu0 }
  0xfc   : > { %v827_v25 = vpop.f32.mrf.mxu3 }
  0xfd   : > { %v846_v26 = vadd.f32 %v827_v25, %v3597_v61 }
  0xfe   : > { %v3671_v29 = vpop.f32.mrf.mxu0 }
  0xff   : > { %v3669_v27 = vadd.f32 %v982_v12, %v846_v26  ;;  %v1198_v12 = vpop.f32.mrf.mxu2 }
 0x104   : > { %v3673_v30 = vpop.f32.mrf.mxu3 }
 0x106   : > { %v992_v28 = vpop.f32.mrf.mxu0 }
 0x10c   : > { %v832_v38 = vpop.f32.mrf.mxu3 }
 0x10d   : > { %v848_v36 = vadd.f32 %v832_v38, %v3614_v18  ;;  %v1046_v18 = vpop.f32.mrf.mxu1 }
 0x10e   : > { %v3684_v61 = vpop.f32.mrf.mxu0 }
 0x10f   : > { %v3680_v32 = vadd.f32 %v987_v24, %v848_v36  ;;  %v3739_v36 = vld [vmem:[#allocation2 + $0x4] sm:$0xf] }
 0x114   : > { %v3682_v39 = vpop.f32.mrf.mxu3 }
 0x115   : > { %v1049_v23 = vpop.f32.mrf.mxu1 }
 0x116   : > { %v1430_v46 = vpop.f32.mrf.mxu0 }
 0x11c   : > { %v837_v42 = vpop.f32.mrf.mxu3 }
 0x11d   : > { %v850_v20 = vadd.f32 %v837_v42, %v3636_v45  ;;  %v603_v45 = vadd.f32 %v3593_v56, %v3570_v31  ;;  %v1051_v56 = vpop.f32.mrf.mxu1  ;;  %v2140_v42 = vld [vmem:[%s4240_s3 + $0x10] sm:$0xf] }
 0x11e   : > { %v1432_v55 = vpop.f32.mrf.mxu0 }
 0x11f   : > { %v3709_v47 = vadd.f32 %v992_v28, %v850_v20  ;;  %v684_v51 = vadd.f32 %v3612_v14, %v603_v45  ;;  %v608_v14 = vadd.f32 %v3580_v40, %v3583_v44  ;;  %v1071_v40 = vadd.f32 %v1049_v23, %v3664_v16  ;;  %v2004_v16 = vld [vmem:[%s4240_s3 + $0xc] sm:$0xf] }
 0x120   : > { %v1665_v23 = vunpack.c.l.b16 %v3739_v36 }
 0x121   : > { %v843_v54 = vadd.f32 %v819_v10, %v684_v51  ;;  %v686_v11 = vadd.f32 %v3568_v33, %v608_v14  ;;  %v1642_v33 = vld [vmem:[#allocation2] sm:$0x8]  ;;  %v1218_v35 = vadd.f32 %v1196_v59, %v1071_v40  ;;  %v1201_v59 = vpop.f32.mrf.mxu2 }
 0x122   : > { %v1735_v53 = vunpack.c.l.b16 %v1642_v33 }
 0x123   : > { %v998_v60 = vadd.f32 %v3634_v43, %v843_v54  ;;  %v1858_v43 = vld [vmem:[%s4240_s3 + $0x8] sm:$0xf]  ;;  %v845_v44 = vadd.f32 %v3666_v22, %v686_v11  ;;  %v2218_v22 = vld [vmem:[%s4240_s3 + $0x14] sm:$0xf] }
 0x124   : > { %v3719_v50 = vpop.f32.mrf.mxu3  ;;  %v1947_v8 = vsel %vm1696_vm7, %v1858_v43, 0  ;;  %v1736_v14 = vpack.c.b16 %v1665_v23, %v1735_v53 }
 0x125   : > { %v1070_v31 = vadd.f32 %v1046_v18, %v998_v60  ;;  %1956 = vmatpush.bf16.msrb.mxu3 %v1947_v8  ;;  %v1054_v28 = vpop.f32.mrf.mxu1  ;;  %v1000_v41 = vadd.f32 %v3649_v1, %v845_v44  ;;  %v1497_v18 = vpop.permute.xlu0 %1496  ;;  %v2171_v1 = vsel %vm1696_vm7, %v2140_v42, 0 }
 0x126   : > { %v1435_v3 = vpop.f32.mrf.mxu0  ;;  %2180 = vmatpush.bf16.msrb.mxu1 %v2171_v1  ;;  %v1073_v40 = vadd.f32 %v1054_v28, %v3669_v27 }
 0x127   : > { %v1217_v9 = vadd.f32 %v1193_v48, %v1070_v31  ;;  %v2271_v48 = vsel %vm1696_vm7, %v2218_v22, 0  ;;  %v1072_v60 = vadd.f32 %v1051_v56, %v1000_v41  ;;  %v1743_v56 = vshrl.u32 %v1736_v14, 16 }
 0x128   : > { %2280 = vmatpush.bf16.msrb.mxu2 %v2271_v48 }
 0x129   : > { %v1745_v36 = vrot.slane %v1743_v56, 3 }
 0x12c   : > { %v1351_v62 = vpop.f32.mrf.mxu3 }
 0x12d   : > { %v1376_v0 = vadd.f32 %v1351_v62, %v1216_v52  ;;  %v2661_v52 = vld [vmem:[%s4244_s7] sm:$0xf] }
 0x12e   : > { %v1437_v51 = vpop.f32.mrf.mxu0 }
 0x12f   : > { %v1455_v6 = vadd.f32 %v1430_v46, %v1376_v0  ;;  %v2093_v46 = vsel %vm1696_vm7, %v2004_v16, 0  ;;  %v1220_v16 = vadd.f32 %v1201_v59, %v1073_v40 }
 0x130   : > { %2102 = vmatpush.bf16.msrb.mxu0 %v2093_v46 }
 0x131   : > { %v1469_v7 = vadd.f32 %v3726_v58, %v1455_v6  ;;  %v1502_v6 = vpop.permute.xlu1 %1501 }
 0x133   : > { %v1539_v10 = vmul.f32 %v1492_v5, %v1469_v7  ;;  %v613_v5 = vadd.f32 %v3602_v63, %v3605_v4 }
 0x134   : > { %v1353_v13 = vpop.f32.mrf.mxu3 }
 0x135   : > { %v1566_v2 = vpack.c.bf16 %v1539_v10, %v1539_v10  ;;  %v1377_v24 = vadd.f32 %v1353_v13, %v1217_v9  ;;  %v1219_v9 = vadd.f32 %v1198_v12, %v1072_v60  ;;  %v1056_v10 = vpop.f32.mrf.mxu1  ;;  %v1746_v13 = vshll.u32 %v1736_v14, 16 }
 0x136   : > { %v1440_v63 = vpop.f32.mrf.mxu0 }
 0x137   : > { %v1589_v25 = vrot.slane %v1566_v2, 7  ;;  %v1456_v26 = vadd.f32 %v1432_v55, %v1377_v24  ;;  %v1748_v12 = vrot.slane %v1746_v13, 4 }
 0x139   : > { %1630 = vst.msk [vmem:[#allocation2 + $0x8] sm:$0xe] %vm1629_vm9, %v1589_v25  ;;  %v1470_v38 = vadd.f32 %v3726_v58, %v1456_v26  ;;  %v1590_v62 = vrot.slane %v1589_v25, 4  ;;  %v1749_v48 = vor.u32 %v1748_v12, %v1745_v36 }
 0x13b   : > { %v1540_v20 = vmul.f32 %v1497_v18, %v1470_v38  ;;  %v1203_v38 = vpop.f32.mrf.mxu2  ;;  %v1507_v18 = vpop.permute.xlu1 %1506 }
 0x13c   : > { %v1356_v45 = vpop.f32.mrf.mxu3 }
 0x13d   : > { %v1567_v54 = vpack.c.bf16 %v1540_v20, %v1540_v20  ;;  %v1378_v55 = vadd.f32 %v1356_v45, %v1218_v35 }
 0x13f   : > { %v1591_v0 = vrot.slane %v1567_v54, 7  ;;  %v1457_v31 = vadd.f32 %v1435_v3, %v1378_v55  ;;  %v688_v3 = vadd.f32 %v3595_v57, %v613_v5 }
 0x140   : > { %v3111_v57 = vld [vmem:[#allocation2 + $0x4] sm:$0xff] }
 0x141   : > { %v1592_v7 = vsel %vm3757_vm12, %v1590_v62, %v1591_v0  ;;  %v1471_v43 = vadd.f32 %v3726_v58, %v1457_v31  ;;  %v847_v4 = vadd.f32 %v3673_v30, %v688_v3  ;;  %v1593_v44 = vrot.slane %v1591_v0, 4  ;;  %v1512_v31 = vpop.permute.xlu2 %1511 }
 0x142   : > { %1631 = vst.msk [vmem:[#allocation2 + $0xc] sm:$0xf] %vm1549_vm8, %v1592_v7  ;;  %v1890_v55 = vshll.u32 %v3111_v57, 16 }
 0x143   : > { %v1541_v8 = vmul.f32 %v1502_v6, %v1471_v43  ;;  %v1002_v22 = vadd.f32 %v3662_v15, %v847_v4  ;;  %v1442_v6 = vpop.f32.mrf.mxu0 }
 0x144   : > { %v1358_v11 = vpop.f32.mrf.mxu3 }
 0x145   : > { %v1568_v2 = vpack.c.bf16 %v1541_v8, %v1541_v8  ;;  %v1379_v24 = vadd.f32 %v1358_v11, %v1219_v9  ;;  %v1074_v59 = vadd.f32 %v1056_v10, %v1002_v22  ;;  %v1892_v9 = vrot.slane %v1890_v55, 1  ;;  %v1206_v10 = vpop.f32.mrf.mxu2 }
 0x146   : > { %v623_v55 = vadd.f32 %v3675_v34, %v3640_v49 }
 0x147   : > { %v1594_v25 = vrot.slane %v1568_v2, 7  ;;  %v1458_v26 = vadd.f32 %v1437_v51, %v1379_v24  ;;  %v1059_v51 = vpop.f32.mrf.mxu1  ;;  %v1221_v8 = vadd.f32 %v1203_v38, %v1074_v59 }
 0x149   : > { %v1595_v33 = vsel %vm3757_vm12, %v1593_v44, %v1594_v25  ;;  %v1472_v35 = vadd.f32 %v3726_v58, %v1458_v26  ;;  %v3773_v41 = vld [vmem:[#allocation2 + $0x8] sm:$0xff]   ;;  %v1596_v62 = vrot.slane %v1594_v25, 4 }
 0x14a   : > { %1632 = vst.msk [vmem:[#allocation2 + $0x10] sm:$0xf] %vm1549_vm8, %v1595_v33  ;;  %v3166_v27 = vunpack.c.l.b16 %v3773_v41  ;;  %v1751_v30 = vshrl.u32 %v3773_v41, 16  ;;  %v1754_v28 = vshll.u32 %v3773_v41, 16 }
 0x14b   : > { %v1542_v42 = vmul.f32 %v1507_v18, %v1472_v35  ;;  %v1445_v18 = vpop.f32.mrf.mxu0 }
 0x14c   : > { %v1361_v20 = vpop.f32.mrf.mxu3  ;;  %v1675_v46 = vpack.c.b16 %v3166_v27, %v1665_v23  ;;  %v1753_v1 = vrot.slane %v1751_v30, 3  ;;  %v1756_v45 = vrot.slane %v1754_v28, 4  ;;  %v618_v23 = vadd.f32 %v3616_v19, %v3621_v17 }
 0x14d   : > { %v1569_v53 = vpack.c.bf16 %v1542_v42, %v1542_v42  ;;  %v1380_v54 = vadd.f32 %v1361_v20, %v1220_v16  ;;  %v1888_v17 = vshrl.u32 %v3111_v57, 16  ;;  %v1517_v57 = vpop.permute.xlu2 %1516 }
 0x14e   : > { %2982 = vmatmul.msk.bf16.vlgmr.msra.gmra.mxu1 %vm1680_vm13, %v1675_v46  ;;  %v3783_v60 = vor.u32 %v1756_v45, %v1753_v1  ;;  %v690_v56 = vadd.f32 %v3618_v21, %v618_v23  ;;  %v1208_v46 = vpop.f32.mrf.mxu2 }
 0x14f   : > { %v1597_v15 = vrot.slane %v1569_v53, 7  ;;  %v1459_v0 = vadd.f32 %v1440_v63, %v1380_v54  ;;  %v1893_v24 = vor.u32 %v1892_v9, %v1888_v17  ;;  %v1075_v63 = vadd.f32 %v1059_v51, %v3680_v32  ;;  %v1061_v44 = vpop.f32.mrf.mxu1  ;;  %v1522_v9 = vpop.permute.xlu0 %1521 }
 0x150   : > { %v1758_v14 = vsel %vm519_vm3, %v1749_v48, %v3783_v60  ;;  %v849_v4 = vadd.f32 %v3682_v39, %v690_v56  ;;  %v2038_v32 = vrot.slane %v1754_v28, 1 }
 0x151   : > { %v1598_v5 = vsel %vm3757_vm12, %v1596_v62, %v1597_v15  ;;  %v1473_v7 = vadd.f32 %v3726_v58, %v1459_v0  ;;  %2987 = vmatmul.msk.bf16.vlgmr.msra.gmra.mxu2 %vm1680_vm13, %v1758_v14  ;;  %v3793_v43 = vld [vmem:[#allocation2 + $0xc] sm:$0xff]  ;;  %v1599_v25 = vrot.slane %v1597_v15, 4  ;;  %v1222_v22 = vadd.f32 %v1206_v10, %v1075_v63 }
 0x152   : > { %1633 = vst.msk [vmem:[#allocation2 + $0x14] sm:$0xf] %vm1549_vm8, %v1598_v5  ;;  %v1895_v11 = vshll.u32 %v3793_v43, 16  ;;  %v1004_v39 = vadd.f32 %v3671_v29, %v849_v4  ;;  %v3279_v1 = vld [vmem:[#allocation2 + $0xc] sm:$0xff]   ;;  %v2039_v29 = vor.u32 %v2038_v32, %v1751_v30  ;;  %v692_v5 = vadd.f32 %v3678_v37, %v623_v55  ;;  %3079 = vmatpush.msk.msra.mxu2 %vm1696_vm7, %v2661_v52 }
 0x153   : > { %v1543_v19 = vmul.f32 %v1512_v31, %v1473_v7  ;;  %v1899_v10 = vshrl.u32 %v3793_v43, 16  ;;  %v1447_v56 = vpop.f32.mrf.mxu0 }
 0x154   : > { %v1363_v13 = vpop.f32.mrf.mxu3  ;;  %v3798_v40 = vrot.slane %v1895_v11, 1  ;;  %v1076_v59 = vadd.f32 %v1061_v44, %v1004_v39  ;;  %v851_v11 = vadd.f32 %v3719_v50, %v692_v5 }
 0x155   : > { %v1570_v3 = vpack.c.bf16 %v1543_v19, %v1543_v19  ;;  %v1381_v2 = vadd.f32 %v1363_v13, %v1221_v8 }
 0x156   : > { %v1898_v36 = vsel %vm1119_vm4, %v1893_v24, %v3798_v40  ;;  %v1223_v7 = vadd.f32 %v1208_v46, %v1076_v59  ;;  %v1901_v24 = vor.u32 %v1899_v10, %v3798_v40  ;;  %v1211_v4 = vpop.f32.mrf.mxu2 }
 0x157   : > { %v1600_v26 = vrot.slane %v1570_v3, 7  ;;  %v1460_v38 = vadd.f32 %v1442_v6, %v1381_v2  ;;  %3012 = vmatmul.msk.bf16.vlgmr.msrb.gmra.mxu3 %vm1680_vm13, %v1898_v36  ;;  %v1064_v30 = vpop.f32.mrf.mxu1 }
 0x158   : > { %v1077_v17 = vadd.f32 %v1064_v30, %v3709_v47 }
 0x159   : > { %v1601_v21 = vsel %vm3757_vm12, %v1599_v25, %v1600_v26  ;;  %v1474_v12 = vadd.f32 %v3726_v58, %v1460_v38  ;;  %v3213_v33 = vld [vmem:[#allocation2 + $0x10] sm:$0xff]   ;;  %v1602_v15 = vrot.slane %v1600_v26, 4 }
 0x15a   : > { %v3808_v35 = vld [vmem:[#allocation2 + $0x10] sm:$0xff]  ;;  %1634 = vst.msk [vmem:[#allocation2 + $0x18] sm:$0xf] %vm1549_vm8, %v1601_v21  ;;  %v1760_v27 = vshrl.u32 %v3213_v33, 16  ;;  %v1763_v16 = vshll.u32 %v3213_v33, 16  ;;  %v1224_v36 = vadd.f32 %v1211_v4, %v1077_v17  ;;  %v1006_v21 = vadd.f32 %v3684_v61, %v851_v11 }
 0x15b   : > { %v1544_v42 = vmul.f32 %v1517_v57, %v1474_v12  ;;  %v2041_v20 = vshll.u32 %v3808_v35, 16  ;;  %v2045_v43 = vshrl.u32 %v3808_v35, 16  ;;  %v1527_v57 = vpop.permute.xlu1 %1526 }
 0x15c   : > { %v1366_v48 = vpop.f32.mrf.mxu3  ;;  %v1762_v45 = vrot.slane %v1760_v27, 3  ;;  %v1765_v51 = vrot.slane %v1763_v16, 4 }
 0x15d   : > { %v1571_v53 = vpack.c.bf16 %v1544_v42, %v1544_v42  ;;  %v1382_v54 = vadd.f32 %v1366_v48, %v1222_v22  ;;  %v3817_v28 = vrot.slane %v2041_v20, 1  ;;  %v2230_v16 = vrot.slane %v2045_v43, 1 }
 0x15e   : > { %2983 = vmatmul.msk.bf16.gmra.mxu1 %vm1680_vm13, %v3279_v1  ;;  %v3822_v62 = vor.u32 %v1765_v51, %v1762_v45  ;;  %v2145_v22 = vrot.slane %v3808_v35, 1  ;;  %v1450_v45 = vpop.f32.mrf.mxu0  ;;  %v2231_v59 = vrot.slane %v2041_v20, 2 }
 0x15f   : > { %v1603_v0 = vrot.slane %v1571_v53, 7  ;;  %v1461_v23 = vadd.f32 %v1445_v18, %v1382_v54  ;;  %v2044_v31 = vsel %vm1119_vm4, %v2039_v29, %v3817_v28  ;;  %v1066_v42 = vpop.f32.mrf.mxu1  ;;  %v2047_v55 = vor.u32 %v2045_v43, %v3817_v28 }
 0x160   : > { %v1767_v41 = vsel %vm519_vm3, %v3783_v60, %v3822_v62  ;;  %3033 = vmatmul.msk.bf16.vlgmr.msrb.gmra.mxu0 %vm1680_vm13, %v2044_v31  ;;  %v3890_v10 = vor.u32 %v2231_v59, %v2230_v16 }
 0x161   : > { %v1604_v49 = vsel %vm3757_vm12, %v1602_v15, %v1603_v0  ;;  %v1475_v34 = vadd.f32 %v3726_v58, %v1461_v23  ;;  %2988 = vmatmul.msk.bf16.gmra.mxu2 %vm1680_vm13, %v1767_v41  ;;  %v3834_v6 = vld [vmem:[#allocation2 + $0x14] sm:$0xff]  ;;  %v1605_v50 = vrot.slane %v1603_v0, 4  ;;  %v1078_v41 = vadd.f32 %v1066_v42, %v1006_v21 }
 0x162   : > { %v3836_v14 = vld [vmem:[#allocation2 + $0x14] sm:$0xff]  ;;  %1635 = vst.msk [vmem:[#allocation2 + $0x1c] sm:$0xf] %vm1549_vm8, %v1604_v49  ;;  %v1903_v8 = vshll.u32 %v3834_v6, 16  ;;  %v1907_v4 = vshrl.u32 %v3834_v6, 16 }
 0x163   : > { %v1545_v60 = vmul.f32 %v1522_v9, %v1475_v34  ;;  %v2366_v19 = vshrl.u32 %v3836_v14, 16  ;;  %v2369_v3 = vshll.u32 %v3836_v14, 16  ;;  %v3281_v53 = vld [vmem:[#allocation2 + $0x14] sm:$0xff]   ;;  %v1213_v9 = vpop.f32.mrf.mxu2 }
 0x164   : > { %v1368_v13 = vpop.f32.mrf.mxu3  ;;  %v3847_v63 = vrot.slane %v1903_v8, 1 }
 0x165   : > { %v1572_v37 = vpack.c.bf16 %v1545_v60, %v1545_v60  ;;  %v1383_v2 = vadd.f32 %v1368_v13, %v1223_v7  ;;  %v2564_v44 = vrot.slane %v2366_v19, 2  ;;  %v2565_v47 = vrot.slane %v2369_v3, 3 }
 0x166   : > { %v1906_v38 = vsel %vm1119_vm4, %v1901_v24, %v3847_v63  ;;  %v1452_v21 = vpop.f32.mrf.mxu0 }
 0x167   : > { %v1606_v25 = vrot.slane %v1572_v37, 7  ;;  %v1462_v26 = vadd.f32 %v1447_v56, %v1383_v2  ;;  %3013 = vmatmul.msk.bf16.gmra.mxu3 %vm1680_vm13, %v1906_v38  ;;  %v3857_v40 = vor.u32 %v2565_v47, %v2564_v44  ;;  %v1532_v37 = vpop.permute.xlu2 %1531  ;;  %v1225_v2 = vadd.f32 %v1213_v9, %v1078_v41 }
 0x168   : > { %v1909_v38 = vor.u32 %v1907_v4, %v3847_v63  ;;  %v2473_v4 = vld [vmem:[%s4240_s3 + $0x1c] sm:$0xf] }
 0x169   : > { %v1607_v12 = vsel %vm3757_vm12, %v1605_v50, %v1606_v25  ;;  %v1476_v33 = vadd.f32 %v3726_v58, %v1462_v26  ;;  %v3214_v32 = vld [vmem:[#allocation2 + $0x18] sm:$0xff]   ;;  %v1608_v20 = vrot.slane %v1606_v25, 4 }
 0x16a   : > { %v3863_v39 = vld [vmem:[#allocation2 + $0x18] sm:$0xff]  ;;  %1636 = vst.msk [vmem:[#allocation2 + $0x20] sm:$0xf] %vm1549_vm8, %v1607_v12  ;;  %v1769_v18 = vshrl.u32 %v3214_v32, 16  ;;  %v1772_v27 = vshll.u32 %v3214_v32, 16 }
 0x16b   : > { %v1546_v46 = vmul.f32 %v1527_v57, %v1476_v33  ;;  %v2049_v61 = vshll.u32 %v3863_v39, 16  ;;  %v2053_v48 = vshrl.u32 %v3863_v39, 16  ;;  %v2147_v1 = vrot.slane %v3863_v39, 1  ;;  %v2328_v57 = vld [vmem:[%s4240_s3 + $0x18] sm:$0xf] }
 0x16c   : > { %v1371_v51 = vpop.f32.mrf.mxu3  ;;  %v1771_v54 = vrot.slane %v1769_v18, 3  ;;  %v1774_v29 = vrot.slane %v1772_v27, 4 }
 0x16d   : > { %v1573_v15 = vpack.c.bf16 %v1546_v46, %v1546_v46  ;;  %v1384_v0 = vadd.f32 %v1371_v51, %v1224_v36  ;;  %v2051_v23 = vrot.slane %v2049_v61, 1  ;;  %v3878_v31 = vsel %vm1391_vm5, %v2145_v22, %v2147_v1 }
 0x16e   : > { %2984 = vmatmul.msk.bf16.gmra.mxu1 %vm1680_vm13, %v3281_v53  ;;  %v3881_v30 = vor.u32 %v1774_v29, %v1771_v54  ;;  %v2234_v28 = vrot.slane %v2053_v48, 1  ;;  %v2235_v49 = vrot.slane %v2049_v61, 2  ;;  %v2426_v61 = vsel %vm1696_vm7, %v2328_v57, 0 }
 0x16f   : > { %v1609_v34 = vrot.slane %v1573_v15, 7  ;;  %v1463_v5 = vadd.f32 %v1450_v45, %v1384_v0  ;;  %v2052_v7 = vsel %vm1119_vm4, %v2047_v55, %v2051_v23  ;;  %v1537_v45 = vpop.permute.xlu0 %1536  ;;  %2435 = vmatpush.bf16.msra.mxu3 %v2426_v61  ;;  %v2055_v41 = vor.u32 %v2053_v48, %v2051_v23 }
 0x170   : > { %v1776_v60 = vsel %vm519_vm3, %v3822_v62, %v3881_v30  ;;  %3034 = vmatmul.msk.bf16.gmra.mxu0 %vm1680_vm13, %v2052_v7  ;;  %v3892_v8 = vor.u32 %v2235_v49, %v2234_v28 }
 0x171   : > { %v1610_v17 = vsel %vm3757_vm12, %v1608_v20, %v1609_v34  ;;  %v1477_v11 = vadd.f32 %v3726_v58, %v1463_v5  ;;  %2989 = vmatmul.msk.bf16.gmra.mxu2 %vm1680_vm13, %v1776_v60  ;;  %v3898_v56 = vld [vmem:[#allocation2 + $0x1c] sm:$0xff]  ;;  %v1611_v12 = vrot.slane %v1609_v34, 4 }
 0x172   : > { %v3900_v13 = vld [vmem:[#allocation2 + $0x1c] sm:$0xff]  ;;  %1637 = vst.msk [vmem:[#allocation2 + $0x24] sm:$0xf] %vm1549_vm8, %v1610_v17  ;;  %v3906_v62 = vsel %vm379_vm1, %v3890_v10, %v3892_v8  ;;  %v1911_v43 = vshll.u32 %v3898_v56, 16 }
 0x173   : > { %v1547_v24 = vmul.f32 %v1532_v37, %v1477_v11  ;;  %v2375_v47 = vshrl.u32 %v3900_v13, 16  ;;  %v2378_v50 = vshll.u32 %v3900_v13, 16  ;;  %v3282_v59 = vld [vmem:[#allocation2 + $0x1c] sm:$0xff]  }
 0x174   : > { %v1373_v44 = vpop.f32.mrf.mxu3  ;;  %v3913_v36 = vrot.slane %v1911_v43, 1  ;;  %v2505_v43 = vsel %vm1696_vm7, %v2473_v4, 0  ;;  %v3217_v4 = vld [vmem:[#allocation2 + $0x8] sm:$0xf0] }
 0x175   : > { %v1574_v25 = vpack.c.bf16 %v1547_v24, %v1547_v24  ;;  %v1385_v26 = vadd.f32 %v1373_v44, %v1225_v2  ;;  %v2568_v18 = vrot.slane %v2375_v47, 2  ;;  %v2569_v63 = vrot.slane %v2378_v50, 3  ;;  %2514 = vmatpush.bf16.msra.mxu0 %v2505_v43 }
 0x176   : > { %v1914_v6 = vsel %vm1119_vm4, %v1909_v38, %v3913_v36 }
 0x177   : > { %v1612_v33 = vrot.slane %v1574_v25, 7  ;;  %v1464_v32 = vadd.f32 %v1452_v21, %v1385_v26  ;;  %3014 = vmatmul.msk.bf16.gmra.mxu3 %vm1680_vm13, %v1914_v6  ;;  %v3941_v28 = vor.u32 %v2569_v63, %v2568_v18  ;;  %v1915_v26 = vshrl.u32 %v3898_v56, 16  ;;  %v2552_v21 = vld [vmem:[%s4240_s3 + $0x20] sm:$0xf] }
 0x179   : > { %v1613_v27 = vsel %vm3757_vm12, %v1611_v12, %v1612_v33  ;;  %v1478_v16 = vadd.f32 %v3726_v58, %v1464_v32  ;;  %v3928_v42 = vld [vmem:[#allocation2 + $0x20] sm:$0xff]   ;;  %v3956_v48 = vsel %vm1266_vm6, %v3857_v40, %v3941_v28  ;;  %v1614_v23 = vrot.slane %v1612_v33, 4 }
 0x17a   : > { %v3930_v46 = vld [vmem:[#allocation2 + $0x20] sm:$0xff]  ;;  %1638 = vst.msk [vmem:[#allocation2 + $0x28] sm:$0xf] %vm1549_vm8, %v1613_v27  ;;  %v1778_v51 = vshrl.u32 %v3928_v42, 16  ;;  %v1781_v53 = vshll.u32 %v3928_v42, 16  ;;  %v2605_v33 = vsel %vm1696_vm7, %v2552_v21, 0  ;;  %v1917_v32 = vor.u32 %v1915_v26, %v3913_v36 }
 0x17b   : > { %v1548_v54 = vmul.f32 %v1537_v45, %v1478_v16  ;;  %v2057_v29 = vshll.u32 %v3930_v46, 16  ;;  %v2061_v55 = vshrl.u32 %v3930_v46, 16  ;;  %v2149_v58 = vrot.slane %v3930_v46, 1  ;;  %2614 = vmatpush.bf16.msra.mxu1 %v2605_v33  ;;  %v3218_v46 = vld [vmem:[#allocation2 + $0x8] sm:$0xe] }
 0x17c   : > { %v1780_v15 = vrot.slane %v1778_v51, 3  ;;  %v1783_v0 = vrot.slane %v1781_v53, 4  ;;  %v3179_v53 = vunpack.c.h.b16 %v3928_v42  ;;  %v2318_v33 = vld [vmem:[#allocation2 + $0x10] sm:$0xf] }
 0x17d   : > { %v1575_v49 = vpack.c.bf16 %v1548_v54, %v1548_v54  ;;  %v2059_v20 = vrot.slane %v2057_v29, 1  ;;  %v3948_v34 = vsel %vm1391_vm5, %v2147_v1, %v2149_v58  ;;  %v2238_v5 = vrot.slane %v2061_v55, 1 }
 0x17e   : > { %2985 = vmatmul.msk.bf16.gmra.mxu1 %vm1680_vm13, %v3282_v59  ;;  %v3951_v7 = vor.u32 %v1783_v0, %v1780_v15  ;;  %v2239_v9 = vrot.slane %v2057_v29, 2 }
 0x17f   : > { %v1615_v60 = vrot.slane %v1575_v49, 7  ;;  %v2060_v17 = vsel %vm1119_vm4, %v2055_v41, %v2059_v20  ;;  %v2063_v15 = vor.u32 %v2061_v55, %v2059_v20 }
 0x180   : > { %v1785_v39 = vsel %vm519_vm3, %v3881_v30, %v3951_v7  ;;  %3035 = vmatmul.msk.bf16.gmra.mxu0 %vm1680_vm13, %v2060_v17  ;;  %v3963_v1 = vor.u32 %v2239_v9, %v2238_v5 }
 0x181   : > { %v1616_v11 = vsel %vm3757_vm12, %v1614_v23, %v1615_v60  ;;  %v1617_v37 = vrot.slane %v1615_v60, 4  ;;  %2990 = vmatmul.msk.bf16.gmra.mxu2 %vm1680_vm13, %v1785_v39  ;;  %v3968_v2 = vld [vmem:[#allocation2 + $0x24] sm:$0xff] }
 0x182   : > { %v1652_v24 = vld [vmem:[#allocation2 + $0x28] sm:$0xf]  ;;  %1639 = vst.msk [vmem:[#allocation2 + $0x2c] sm:$0xf] %vm1549_vm8, %v1616_v11  ;;  %v3981_v44 = vsel %vm379_vm1, %v3892_v8, %v3963_v1  ;;  %v1919_v38 = vshll.u32 %v3968_v2, 16 }
 0x183   : > { %v1674_v30 = vunpack.c.l.b16 %v1652_v24  ;;  %v3983_v25 = vld [vmem:[#allocation2 + $0x24] sm:$0xff]  ;;  %1641 = vst.msk [vmem:[#allocation2 + $0x30] sm:$0x1] %vm1640_vm14, %v1617_v37 }
 0x184   : > { %v2384_v8 = vshrl.u32 %v3983_v25, 16  ;;  %v1921_v6 = vrot.slane %v1919_v38, 1  ;;  %v2387_v56 = vshll.u32 %v3983_v25, 16 }
 0x185   : > { %v1741_v12 = vpack.c.b16 %v1674_v30, %v1674_v30  ;;  %v1679_v9 = vpack.c.b16 %v1674_v30, %v3179_v53 }
 0x186   : > { %v2572_v63 = vrot.slane %v2384_v8, 2  ;;  %v1922_v27 = vsel %vm1119_vm4, %v1917_v32, %v1921_v6  ;;  %v2573_v45 = vrot.slane %v2387_v56, 3  ;;  %v1923_v32 = vshrl.u32 %v3968_v2, 16 }
 0x187   : > { %v1787_v57 = vshrl.u32 %v1741_v12, 16  ;;  %v1790_v18 = vshll.u32 %v1741_v12, 16  ;;  %3015 = vmatmul.msk.bf16.gmra.mxu3 %vm1680_vm13, %v1922_v27  ;;  %v3219_v12 = vor.u32 %v3218_v46, %v3217_v4  ;;  %v2341_v27 = vunpack.c.l.b16 %v2318_v33 }
 0x188   : > { %v2574_v59 = vor.u32 %v2573_v45, %v2572_v63  ;;  %v2317_v63 = vld [vmem:[#allocation2 + $0xc] sm:$0xe]  ;;  %v2380_v46 = vrot.slane %v2378_v50, 2  ;;  %v2386_v50 = vrot.slane %v2384_v8, 1  ;;  %v2389_v33 = vrot.slane %v2387_v56, 2 }
 0x189   : > { %v1789_v16 = vrot.slane %v1787_v57, 3  ;;  %v1792_v61 = vrot.slane %v1790_v18, 4  ;;  %v3119_v51 = vld [vmem:[#allocation2 + $0x28] sm:$0xff] }
 0x18a   : > { %v1857_v36 = vld [vmem:[#allocation2 + $0x2c] sm:$0x1]  ;;  %v2003_v29 = vld [vmem:[#allocation2 + $0x30] sm:$0x1]  ;;  %v2065_v0 = vshll.u32 %v3119_v51, 16  ;;  %v2069_v49 = vshrl.u32 %v3119_v51, 16  ;;  %v4027_v21 = vsel %vm1266_vm6, %v3941_v28, %v2574_v59 }
 0x18b   : > { %v1880_v54 = vunpack.c.l.b16 %v1857_v36  ;;  %v2026_v41 = vunpack.c.l.b16 %v2003_v29  ;;  %v4003_v5 = vld [vmem:[#allocation2 + $0x2c] sm:$0xff]  ;;  %v1793_v23 = vor.u32 %v1792_v61, %v1789_v16  ;;  %v2151_v17 = vrot.slane %v3119_v51, 1 }
 0x18c   : > { %v2067_v39 = vrot.slane %v2065_v0, 1  ;;  %v2242_v37 = vrot.slane %v2069_v49, 1  ;;  %v2243_v24 = vrot.slane %v2065_v0, 2  ;;  %v2393_v30 = vshrl.u32 %v4003_v5, 16 }
 0x18d   : > { %v1886_v60 = vpack.c.b16 %v1880_v54, %v1880_v54  ;;  %v2032_v11 = vpack.c.b16 %v2026_v41, %v2026_v41  ;;  %v4009_v42 = vsel %vm1391_vm5, %v2149_v58, %v2151_v17  ;;  %v1794_v52 = vsel %vm519_vm3, %v3951_v7, %v1793_v23 }
 0x18e   : > { %2986 = vmatmul.msk.bf16.gmra.mxu1 %vm1680_vm13, %v1679_v9  ;;  %v2068_v55 = vsel %vm1119_vm4, %v2063_v15, %v2067_v39  ;;  %v4012_v43 = vor.u32 %v2243_v24, %v2242_v37  ;;  %v2396_v38 = vshll.u32 %v4003_v5, 16  ;;  %v2576_v18 = vrot.slane %v2393_v30, 2  ;;  %v2472_v24 = vld [vmem:[#allocation2 + $0xc] sm:$0xc] }
 0x18f   : > { %v1927_v20 = vshll.u32 %v1886_v60, 16  ;;  %v2153_v26 = vrot.slane %v2032_v11, 1  ;;  %v2223_v61 = vshrl.u32 %v3219_v12, 16  ;;  %v2226_v28 = vshll.u32 %v3219_v12, 16 }
 0x190   : > { %3036 = vmatmul.msk.bf16.gmra.mxu0 %vm1680_vm13, %v2068_v55  ;;  %v4022_v58 = vsel %vm379_vm1, %v3963_v1, %v4012_v43  ;;  %v1925_v1 = vor.u32 %v1923_v32, %v1921_v6  ;;  %v2577_v16 = vrot.slane %v2396_v38, 3  ;;  %v2073_v51 = vshll.u32 %v2032_v11, 16 }
 0x191   : > { %2991 = vmatmul.msk.bf16.gmra.mxu2 %vm1680_vm13, %v1794_v52  ;;  %v4030_v7 = vsel %vm1391_vm5, %v2151_v17, %v2153_v26  ;;  %v1929_v57 = vrot.slane %v1927_v20, 1  ;;  %v2340_v36 = vunpack.c.l.b16 %v2317_v63  ;;  %v2225_v6 = vrot.slane %v2223_v61, 1 }
 0x192   : > { %v4038_v53 = vor.u32 %v2577_v16, %v2576_v18  ;;  %v2228_v29 = vrot.slane %v2226_v28, 2  ;;  %v2144_v15 = vrot.slane %v3219_v12, 1  ;;  %v2075_v0 = vrot.slane %v2073_v51, 1 }
 0x193   : > { %v1930_v45 = vsel %vm1119_vm4, %v1925_v1, %v1929_v57  ;;  %v2351_v2 = vpack.c.b16 %v2341_v27, %v2340_v36  ;;  %v2071_v9 = vor.u32 %v2069_v49, %v2067_v39  ;;  %v2371_v37 = vrot.slane %v2369_v3, 2  ;;  %v2327_v1 = vld [vmem:[#allocation2 + $0x34] sm:$0x3] }
 0x194   : > { %v4043_v54 = vsel %vm1266_vm6, %v2574_v59, %v4038_v53  ;;  %v2146_v41 = vsel %vm1391_vm5, %v2144_v15, %v2145_v22  ;;  %v2229_v17 = vor.u32 %v2228_v29, %v2225_v6  ;;  %v2368_v59 = vrot.slane %v2366_v19, 1 }
 0x195   : > { %v2358_v23 = vshrl.u32 %v2351_v2, 16  ;;  %v2361_v60 = vshll.u32 %v2351_v2, 16  ;;  %v2076_v11 = vsel %vm1119_vm4, %v2071_v9, %v2075_v0  ;;  %v2475_v4 = vunpack.c.l.b16 %v2472_v24 }
 0x196   : > { %v2233_v35 = vsel %vm379_vm1, %v2229_v17, %v3890_v10  ;;  %v2372_v39 = vor.u32 %v2371_v37, %v2368_v59  ;;  %v2479_v3 = vrot.slane %v3836_v14, 2  ;;  %v2377_v26 = vrot.slane %v2375_v47, 1 }
 0x197   : > { %3016 = vmatmul.msk.bf16.gmra.mxu3 %vm1680_vm13, %v1930_v45  ;;  %v2360_v22 = vrot.slane %v2358_v23, 1  ;;  %v2363_v49 = vrot.slane %v2361_v60, 2  ;;  %v4060_v19 = vpack.c.b16 %v2341_v27, %v2475_v4  ;;  %v2483_v57 = vrot.slane %v3983_v25, 2 }
 0x198   : > { %v2381_v14 = vor.u32 %v2380_v46, %v2377_v26  ;;  %v2395_v56 = vrot.slane %v2393_v30, 1  ;;  %v2350_v16 = vunpack.c.l.b16 %v2327_v1  ;;  %v2485_v29 = vrot.slane %v4003_v5, 2 }
 0x199   : > { %v2364_v55 = vor.u32 %v2363_v49, %v2360_v22  ;;  %v2478_v52 = vrot.slane %v4060_v19, 2 }
 0x19a   : > { %v2382_v12 = vsel %vm379_vm1, %v2372_v39, %v2381_v14  ;;  %v2356_v30 = vpack.c.b16 %v2350_v16, %v2350_v16 }
 0x19b   : > { %v2373_v20 = vsel %vm379_vm1, %v2364_v55, %v2372_v39  ;;  %v2480_v10 = vsel %vm2477_vm15, %v2478_v52, %v2479_v3  ;;  %v2557_v39 = vshrl.u32 %v4060_v19, 16 }
 0x19c   : > { %v2402_v15 = vshrl.u32 %v2356_v30, 16 }
 0x19d   : > { %v2559_v52 = vrot.slane %v2557_v39, 2 }
 0x19e   : > { %3038 = vmatmul.msk.bf16.vlgmr.msrb.gmra.mxu1 %vm1680_vm13, %v2146_v41  ;;  %v2404_v59 = vrot.slane %v2402_v15, 1  ;;  %v2654_v15 = vld [vmem:[%s4124_s14 + $0x18] sm:$0xff] }
 0x1a0   : > { %3037 = vmatmul.msk.bf16.gmra.mxu0 %vm1680_vm13, %v2076_v11  ;;  %v2486_v11 = vsel %vm2477_vm15, %v2483_v57, %v2485_v29 }
 0x1a1   : > { %3043 = vmatmul.msk.bf16.vlgmr.msrb.gmra.mxu2 %vm1680_vm13, %v2233_v35 }
 0x1a7   : > { %3064 = vmatmul.msk.bf16.vlgmr.msra.gmra.mxu3 %vm1680_vm13, %v2373_v20 }
 0x1ae   : > { %3039 = vmatmul.msk.bf16.gmra.mxu1 %vm1680_vm13, %v3878_v31  ;;  %v2481_v31 = vrot.slane %v3900_v13, 2  ;;  %v2217_v13 = vld [vmem:[#allocation2 + $0x30] sm:$0x3] }
 0x1af   : > { %v2220_v18 = vunpack.c.l.b16 %v2217_v13 }
 0x1b0   : > { %3069 = vmatmul.msk.bf16.vlgmr.msra.gmra.mxu0 %vm1680_vm13, %v2480_v10  ;;  %v2482_v47 = vsel %vm2477_vm15, %v2479_v3, %v2481_v31  ;;  %v2484_v8 = vsel %vm2477_vm15, %v2481_v31, %v2483_v57 }
 0x1b1   : > { %3044 = vmatmul.msk.bf16.gmra.mxu2 %vm1680_vm13, %v3906_v62  ;;  %v2390_v62 = vor.u32 %v2389_v33, %v2386_v50  ;;  %v2221_v63 = vpack.c.b16 %v2220_v18, %v2220_v18 }
 0x1b3   : > { %v2391_v32 = vsel %vm379_vm1, %v2381_v14, %v2390_v62  ;;  %v2250_v28 = vshll.u32 %v2221_v63, 16 }
 0x1b5   : > { %v2252_v36 = vrot.slane %v2250_v28, 2 }
 0x1b7   : > { %3065 = vmatmul.msk.bf16.gmra.mxu3 %vm1680_vm13, %v2382_v12  ;;  %v2487_v12 = vrot.slane %v2356_v30, 2 }
 0x1b9   : > { %v2488_v13 = vsel %vm2477_vm15, %v2485_v29, %v2487_v12  ;;  %v2657_v12 = vld [vmem:[%s4124_s14 + $0x30] sm:$0xff] }
 0x1be   : > { %3040 = vmatmul.msk.bf16.gmra.mxu1 %vm1680_vm13, %v3948_v34 }
 0x1c0   : > { %3070 = vmatmul.msk.bf16.gmra.mxu0 %vm1680_vm13, %v2482_v47 }
 0x1c1   : > { %3045 = vmatmul.msk.bf16.gmra.mxu2 %vm1680_vm13, %v3981_v44  ;;  %v2398_v44 = vrot.slane %v2396_v38, 2 }
 0x1c3   : > { %v2399_v27 = vor.u32 %v2398_v44, %v2395_v56 }
 0x1c5   : > { %v2400_v51 = vsel %vm379_vm1, %v2390_v62, %v2399_v27 }
 0x1c7   : > { %3066 = vmatmul.msk.bf16.gmra.mxu3 %vm1680_vm13, %v2391_v32  ;;  %v2651_v32 = vld [vmem:[%s4124_s14] sm:$0xff] }
 0x1cb   : > { %v1709_v34 = vpop.f32.mrf.mxu1 }
 0x1ce   : > { %3041 = vmatmul.msk.bf16.gmra.mxu1 %vm1680_vm13, %v4009_v42  ;;  %v2247_v42 = vshrl.u32 %v2221_v63, 16 }
 0x1d0   : > { %3071 = vmatmul.msk.bf16.gmra.mxu0 %vm1680_vm13, %v2484_v8  ;;  %v2249_v38 = vrot.slane %v2247_v42, 1 }
 0x1d1   : > { %3046 = vmatmul.msk.bf16.gmra.mxu2 %vm1680_vm13, %v4022_v58  ;;  %v2405_v58 = vshll.u32 %v2356_v30, 16 }
 0x1d2   : > { %v2253_v9 = vor.u32 %v2252_v36, %v2249_v38 }
 0x1d3   : > { %v1711_v25 = vpop.f32.mrf.mxu1  ;;  %v2407_v37 = vrot.slane %v2405_v58, 2 }
 0x1d4   : > { %v1822_v61 = vpop.f32.mrf.mxu2  ;;  %v2254_v35 = vsel %vm379_vm1, %v4012_v43, %v2253_v9 }
 0x1d5   : > { %v1823_v45 = vadd.f32 %v1822_v61, %v1709_v34  ;;  %v2408_v49 = vor.u32 %v2407_v37, %v2404_v59 }
 0x1d7   : > { %3067 = vmatmul.msk.bf16.gmra.mxu3 %vm1680_vm13, %v2400_v51  ;;  %v2409_v43 = vsel %vm379_vm1, %v2399_v27, %v2408_v49 }
 0x1da   : > { %v1958_v6 = vpop.f32.mrf.mxu3 }
 0x1db   : > { %v1714_v2 = vpop.f32.mrf.mxu1  ;;  %v1983_v41 = vadd.f32 %v1958_v6, %v1823_v45  ;;  %v2653_v45 = vld [vmem:[%s4124_s14 + $0x10] sm:$0xff] }
 0x1dc   : > { %v1824_v0 = vpop.f32.mrf.mxu2 }
 0x1dd   : > { %v1825_v23 = vadd.f32 %v1824_v0, %v1711_v25  ;;  %v2104_v60 = vpop.f32.mrf.mxu0 }
 0x1de   : > { %v4103_v17 = vadd.f32 %v2104_v60, %v1983_v41  ;;  %3042 = vmatmul.msk.bf16.gmra.mxu1 %vm1680_vm13, %v4030_v7  ;;  %v2560_v7 = vshll.u32 %v4060_v19, 16 }
 0x1e0   : > { %3072 = vmatmul.msk.bf16.gmra.mxu0 %vm1680_vm13, %v2486_v11  ;;  %v2562_v10 = vrot.slane %v2560_v7, 3  ;;  %v2655_v11 = vld [vmem:[%s4124_s14 + $0x20] sm:$0xff]  ;;  %v2656_v7 = vld [vmem:[%s4124_s14 + $0x28] sm:$0xff] }
 0x1e1   : > { %3047 = vmatmul.msk.bf16.gmra.mxu2 %vm1680_vm13, %v2254_v35 }
 0x1e2   : > { %v1960_v22 = vpop.f32.mrf.mxu3  ;;  %v2563_v14 = vor.u32 %v2562_v10, %v2559_v52 }
 0x1e3   : > { %v1716_v5 = vpop.f32.mrf.mxu1  ;;  %v1984_v55 = vadd.f32 %v1960_v22, %v1825_v23 }
 0x1e4   : > { %v1827_v24 = vpop.f32.mrf.mxu2  ;;  %v2567_v33 = vsel %vm1266_vm6, %v2563_v14, %v3857_v40  ;;  %v2652_v40 = vld [vmem:[%s4124_s14 + $0x8] sm:$0xff] }
 0x1e5   : > { %v1828_v20 = vadd.f32 %v1827_v24, %v1714_v2  ;;  %v2106_v4 = vpop.f32.mrf.mxu0  ;;  %v2551_v24 = vld [vmem:[#allocation2 + $0x34] sm:$0x7] }
 0x1e6   : > { %v4114_v3 = vadd.f32 %v2106_v4, %v1984_v55  ;;  %v2554_v55 = vunpack.c.l.b16 %v2551_v24 }
 0x1e7   : > { %3068 = vmatmul.msk.bf16.gmra.mxu3 %vm1680_vm13, %v2409_v43 }
 0x1ea   : > { %v1963_v46 = vpop.f32.mrf.mxu3 }
 0x1eb   : > { %v1719_v26 = vpop.f32.mrf.mxu1  ;;  %v1985_v31 = vadd.f32 %v1963_v46, %v1828_v20  ;;  %v2555_v46 = vpack.c.b16 %v2554_v55, %v2554_v55 }
 0x1ec   : > { %v1829_v19 = vpop.f32.mrf.mxu2 }
 0x1ed   : > { %v1830_v47 = vadd.f32 %v1829_v19, %v1716_v5  ;;  %v2109_v50 = vpop.f32.mrf.mxu0  ;;  %v2581_v19 = vshrl.u32 %v2555_v46, 16 }
 0x1ee   : > { %v4128_v62 = vadd.f32 %v2109_v50, %v1985_v31  ;;  %3074 = vmatmul.msk.bf16.vlgmr.msra.gmra.mxu1 %vm1680_vm13, %v2567_v33  ;;  %v2584_v31 = vshll.u32 %v2555_v46, 16  ;;  %v4190_v46 = vld [vmem:[%s4241_s4] ss:$0 sm:$0xff] }
 0x1f0   : > { %3073 = vmatmul.msk.bf16.gmra.mxu0 %vm1680_vm13, %v2488_v13 }
 0x1f1   : > { %3080 = vmatmul.msk.f32.vlgmr.msra.gmra.mxu2 %vm437_vm2, %v2651_v32 }
 0x1f2   : > { %v1965_v57 = vpop.f32.mrf.mxu3 }
 0x1f3   : > { %v1721_v34 = vpop.f32.mrf.mxu1  ;;  %v1986_v8 = vadd.f32 %v1965_v57, %v1830_v47  ;;  %v2583_v57 = vrot.slane %v2581_v19, 2 }
 0x1f4   : > { %v1832_v18 = vpop.f32.mrf.mxu2 }
 0x1f5   : > { %v1833_v56 = vadd.f32 %v1832_v18, %v1719_v26  ;;  %v2111_v44 = vpop.f32.mrf.mxu0  ;;  %v2586_v18 = vrot.slane %v2584_v31, 3 }
 0x1f6   : > { %v4135_v63 = vadd.f32 %v2111_v44, %v1986_v8 }
 0x1f9   : > { %3081 = vmatmul.msk.f32.gmra.mxu2 %vm437_vm2, %v2652_v40 }
 0x1fa   : > { %v1968_v25 = vpop.f32.mrf.mxu3 }
 0x1fb   : > { %v1724_v1 = vpop.f32.mrf.mxu1  ;;  %v1987_v16 = vadd.f32 %v1968_v25, %v1833_v56  ;;  %v2658_v56 = vld [vmem:[%s4124_s14 + $0x38] sm:$0xff] }
 0x1fc   : > { %v1834_v27 = vpop.f32.mrf.mxu2 }
 0x1fd   : > { %v1835_v61 = vadd.f32 %v1834_v27, %v1721_v34  ;;  %v2114_v42 = vpop.f32.mrf.mxu0  ;;  %v2659_v27 = vld [vmem:[%s4124_s14 + $0x40] sm:$0xff] }
 0x1fe   : > { %v4139_v28 = vadd.f32 %v2114_v42, %v1987_v16  ;;  %3075 = vmatmul.msk.bf16.gmra.mxu1 %vm1680_vm13, %v3956_v48 }
 0x201   : > { %3082 = vmatmul.msk.f32.gmra.mxu2 %vm437_vm2, %v2653_v45 }
 0x202   : > { %v1970_v30 = vpop.f32.mrf.mxu3 }
 0x203   : > { %v1726_v51 = vpop.f32.mrf.mxu1  ;;  %v1988_v36 = vadd.f32 %v1970_v30, %v1835_v61 }
 0x204   : > { %v1837_v38 = vpop.f32.mrf.mxu2 }
 0x205   : > { %v1838_v2 = vadd.f32 %v1837_v38, %v1724_v1  ;;  %v2116_v6 = vpop.f32.mrf.mxu0 }
 0x206   : > { %v4145_v29 = vadd.f32 %v2116_v6, %v1988_v36 }
 0x209   : > { %3083 = vmatmul.msk.f32.gmra.mxu2 %vm437_vm2, %v2654_v15 }
 0x20a   : > { %v1973_v0 = vpop.f32.mrf.mxu3 }
 0x20b   : > { %v1729_v58 = vpop.f32.mrf.mxu1  ;;  %v1989_v48 = vadd.f32 %v1973_v0, %v1838_v2 }
 0x20c   : > { %v1839_v41 = vpop.f32.mrf.mxu2 }
 0x20d   : > { %v1840_v9 = vadd.f32 %v1839_v41, %v1726_v51  ;;  %v2119_v23 = vpop.f32.mrf.mxu0  ;;  %v2660_v51 = vld [vmem:[%s4124_s14 + $0x48] sm:$0xff] }
 0x20e   : > { %v4149_v60 = vadd.f32 %v2119_v23, %v1989_v48  ;;  %3076 = vmatmul.msk.bf16.gmra.mxu1 %vm1680_vm13, %v4027_v21 }
 0x211   : > { %3084 = vmatmul.msk.f32.gmra.mxu2 %vm437_vm2, %v2655_v11 }
 0x212   : > { %v1975_v37 = vpop.f32.mrf.mxu3 }
 0x213   : > { %v1731_v59 = vpop.f32.mrf.mxu1  ;;  %v1990_v5 = vadd.f32 %v1975_v37, %v1840_v9 }
 0x214   : > { %v1842_v35 = vpop.f32.mrf.mxu2 }
 0x215   : > { %v1843_v22 = vadd.f32 %v1842_v35, %v1729_v58  ;;  %v2121_v49 = vpop.f32.mrf.mxu0 }
 0x216   : > { %v2136_v39 = vadd.f32 %v2121_v49, %v1990_v5 }
 0x219   : > { %3085 = vmatmul.msk.f32.gmra.mxu2 %vm437_vm2, %v2656_v7 }
 0x21a   : > { %v1978_v4 = vpop.f32.mrf.mxu3 }
 0x21b   : > { %v2182_v20 = vpop.f32.mrf.mxu1  ;;  %v1991_v52 = vadd.f32 %v1978_v4, %v1843_v22 }
 0x21c   : > { %v2207_v21 = vadd.f32 %v2182_v20, %v4103_v17  ;;  %v1844_v43 = vpop.f32.mrf.mxu2 }
 0x21d   : > { %v1845_v10 = vadd.f32 %v1844_v43, %v1731_v59  ;;  %v2124_v26 = vpop.f32.mrf.mxu0 }
 0x21e   : > { %v2137_v14 = vadd.f32 %v2124_v26, %v1991_v52  ;;  %3077 = vmatmul.msk.bf16.gmra.mxu1 %vm1680_vm13, %v4043_v54  ;;  %v2587_v54 = vor.u32 %v2586_v18, %v2583_v57 }
 0x221   : > { %3086 = vmatmul.msk.f32.gmra.mxu2 %vm437_vm2, %v2657_v12 }
 0x222   : > { %v1980_v50 = vpop.f32.mrf.mxu3 }
 0x223   : > { %v2184_v47 = vpop.f32.mrf.mxu1  ;;  %v1992_v17 = vadd.f32 %v1980_v50, %v1845_v10 }
 0x224   : > { %v2208_v33 = vadd.f32 %v2184_v47, %v4114_v3  ;;  %v2282_v32 = vpop.f32.mrf.mxu2  ;;  %v2588_v3 = vsel %vm1266_vm6, %v4038_v53, %v2587_v54 }
 0x225   : > { %v2307_v13 = vadd.f32 %v2282_v32, %v2207_v21  ;;  %v2126_v34 = vpop.f32.mrf.mxu0 }
 0x226   : > { %v2138_v8 = vadd.f32 %v2126_v34, %v1992_v17 }
 0x229   : > { %3087 = vmatmul.msk.f32.gmra.mxu2 %vm437_vm2, %v2658_v56 }
 0x22a   : > { %v2437_v9 = vpop.f32.mrf.mxu3 }
 0x22b   : > { %v2187_v44 = vpop.f32.mrf.mxu1  ;;  %v2462_v4 = vadd.f32 %v2437_v9, %v2307_v13 }
 0x22c   : > { %v2209_v40 = vadd.f32 %v2187_v44, %v4128_v62  ;;  %v2284_v1 = vpop.f32.mrf.mxu2 }
 0x22d   : > { %v2308_v25 = vadd.f32 %v2284_v1, %v2208_v33 }
 0x22e   : > { %3078 = vmatmul.msk.bf16.gmra.mxu1 %vm1680_vm13, %v2588_v3 }
 0x231   : > { %3088 = vmatmul.msk.f32.gmra.mxu2 %vm437_vm2, %v2659_v27 }
 0x233   : > { %v2189_v16 = vpop.f32.mrf.mxu1 }
 0x234   : > { %v2210_v61 = vadd.f32 %v2189_v16, %v4135_v63  ;;  %v2287_v42 = vpop.f32.mrf.mxu2 }
 0x235   : > { %v2309_v45 = vadd.f32 %v2287_v42, %v2209_v40 }
 0x239   : > { %3089 = vmatmul.msk.f32.gmra.mxu2 %vm437_vm2, %v2660_v51 }
 0x23b   : > { %v2192_v30 = vpop.f32.mrf.mxu1 }
 0x23c   : > { %v2211_v62 = vadd.f32 %v2192_v30, %v4139_v28  ;;  %v2289_v38 = vpop.f32.mrf.mxu2  ;;  %v2516_v28 = vpop.f32.mrf.mxu0 }
 0x23d   : > { %v2310_v36 = vadd.f32 %v2289_v38, %v2210_v61  ;;  %v2541_v52 = vadd.f32 %v2516_v28, %v2462_v4 }
 0x243   : > { %v2194_v2 = vpop.f32.mrf.mxu1 }
 0x244   : > { %v2212_v53 = vadd.f32 %v2194_v2, %v4145_v29  ;;  %v2292_v6 = vpop.f32.mrf.mxu2  ;;  %v2439_v29 = vpop.f32.mrf.mxu3 }
 0x245   : > { %v2311_v15 = vadd.f32 %v2292_v6, %v2211_v62  ;;  %v2518_v49 = vpop.f32.mrf.mxu0 }
 0x24b   : > { %v2197_v58 = vpop.f32.mrf.mxu1 }
 0x24c   : > { %v2213_v0 = vadd.f32 %v2197_v58, %v4149_v60  ;;  %v2294_v41 = vpop.f32.mrf.mxu2  ;;  %v2442_v20 = vpop.f32.mrf.mxu3 }
 0x24d   : > { %v4177_v63 = vadd.f32 %v2294_v41, %v2212_v53  ;;  %v2521_v21 = vpop.f32.mrf.mxu0  ;;  %v2464_v34 = vadd.f32 %v2442_v20, %v2309_v45 }
 0x24f   : > { %v2543_v54 = vadd.f32 %v2521_v21, %v2464_v34 }
 0x253   : > { %v2199_v48 = vpop.f32.mrf.mxu1 }
 0x254   : > { %v2214_v23 = vadd.f32 %v2199_v48, %v2136_v39  ;;  %v2297_v11 = vpop.f32.mrf.mxu2  ;;  %v2444_v12 = vpop.f32.mrf.mxu3 }
 0x255   : > { %v4179_v59 = vadd.f32 %v2297_v11, %v2213_v0  ;;  %v2523_v17 = vpop.f32.mrf.mxu0  ;;  %v2465_v3 = vadd.f32 %v2444_v12, %v2310_v36 }
 0x257   : > { %v2544_v42 = vadd.f32 %v2523_v17, %v2465_v3 }
 0x25b   : > { %v2202_v37 = vpop.f32.mrf.mxu1 }
 0x25c   : > { %v2215_v35 = vadd.f32 %v2202_v37, %v2137_v14  ;;  %v2299_v5 = vpop.f32.mrf.mxu2  ;;  %v2463_v14 = vadd.f32 %v2439_v29, %v2308_v25 }
 0x25d   : > { %v4181_v22 = vadd.f32 %v2299_v5, %v2214_v23  ;;  %v2526_v25 = vpop.f32.mrf.mxu0 }
 0x25e   : > { %v2542_v50 = vadd.f32 %v2518_v49, %v2463_v14 }
 0x263   : > { %v2204_v7 = vpop.f32.mrf.mxu1 }
 0x264   : > { %v2216_v24 = vadd.f32 %v2204_v7, %v2138_v8  ;;  %v2302_v60 = vpop.f32.mrf.mxu2  ;;  %v2447_v8 = vpop.f32.mrf.mxu3 }
 0x265   : > { %v4183_v55 = vadd.f32 %v2302_v60, %v2215_v35  ;;  %v2466_v38 = vadd.f32 %v2447_v8, %v2311_v15  ;;  %v2528_v2 = vpop.f32.mrf.mxu0 }
 0x267   : > { %v2545_v58 = vadd.f32 %v2526_v25, %v2466_v38 }
 0x26b   : > { %v2616_v39 = vpop.f32.mrf.mxu1 }
 0x26c   : > { %v2304_v43 = vpop.f32.mrf.mxu2  ;;  %v2641_v26 = vadd.f32 %v2616_v39, %v2541_v52  ;;  %v2449_v51 = vpop.f32.mrf.mxu3 }
 0x26d   : > { %v4185_v10 = vadd.f32 %v2304_v43, %v2216_v24  ;;  %v2467_v23 = vadd.f32 %v2449_v51, %v4177_v63  ;;  %v2531_v28 = vpop.f32.mrf.mxu0 }
 0x26e   : > { %v2746_v31 = vadd.f32 %v4190_v46, %v2641_v26 }
 0x26f   : > { %v2546_v35 = vadd.f32 %v2528_v2, %v2467_v23 }
 0x273   : > { %v2618_v19 = vpop.f32.mrf.mxu1 }
 0x274   : > { %v2712_v47 = vpop.f32.mrf.mxu2  ;;  %v2642_v32 = vadd.f32 %v2618_v19, %v2542_v50  ;;  %v2452_v9 = vpop.f32.mrf.mxu3 }
 0x275   : > { %v2756_v33 = vadd.f32 %v2746_v31, %v2712_v47  ;;  %v2468_v7 = vadd.f32 %v2452_v9, %v4179_v59  ;;  %v2533_v21 = vpop.f32.mrf.mxu0 }
 0x276   : > { %v2747_v18 = vadd.f32 %v4190_v46, %v2642_v32 }
 0x277   : > { %v2766_v13 = vmax.f32 %v2756_v33, 0.0  ;;  %v2547_v4 = vadd.f32 %v2531_v28, %v2468_v7 }
 0x279   : > { %2776 = vst.msk [vmem:[%s4198_s20] sm:$0xff] %vm1680_vm13, %v2766_v13 }
 0x27b   : > { %v2621_v57 = vpop.f32.mrf.mxu1 }
 0x27c   : > { %v2715_v56 = vpop.f32.mrf.mxu2  ;;  %v2643_v40 = vadd.f32 %v2621_v57, %v2543_v54  ;;  %v2454_v24 = vpop.f32.mrf.mxu3 }
 0x27d   : > { %v2757_v44 = vadd.f32 %v2747_v18, %v2715_v56  ;;  %v2469_v26 = vadd.f32 %v2454_v24, %v4181_v22  ;;  %v2536_v17 = vpop.f32.mrf.mxu0 }
 0x27e   : > { %v2748_v16 = vadd.f32 %v4190_v46, %v2643_v40 }
 0x27f   : > { %v2767_v1 = vmax.f32 %v2757_v44, 0.0  ;;  %v2548_v31 = vadd.f32 %v2533_v21, %v2469_v26 }
 0x281   : > { %2777 = vst.msk [vmem:[%s4198_s20 + $0x8] sm:$0xff] %vm1680_vm13, %v2767_v1 }
 0x283   : > { %v2623_v27 = vpop.f32.mrf.mxu1 }
 0x284   : > { %v2718_v61 = vpop.f32.mrf.mxu2  ;;  %v2644_v30 = vadd.f32 %v2623_v27, %v2544_v42  ;;  %v2457_v12 = vpop.f32.mrf.mxu3 }
 0x285   : > { %v2758_v45 = vadd.f32 %v2748_v16, %v2718_v61  ;;  %v2470_v32 = vadd.f32 %v2457_v12, %v4183_v55  ;;  %v2538_v40 = vpop.f32.mrf.mxu0 }
 0x286   : > { %v2749_v6 = vadd.f32 %v4190_v46, %v2644_v30 }
 0x287   : > { %v2768_v62 = vmax.f32 %v2758_v45, 0.0  ;;  %v2549_v57 = vadd.f32 %v2536_v17, %v2470_v32 }
 0x289   : > { %2778 = vst.msk [vmem:[%s4198_s20 + $0x10] sm:$0xff] %vm1680_vm13, %v2768_v62 }
 0x28b   : > { %v2626_v53 = vpop.f32.mrf.mxu1 }
 0x28c   : > { %v2721_v36 = vpop.f32.mrf.mxu2  ;;  %v2645_v41 = vadd.f32 %v2626_v53, %v2545_v58  ;;  %v2459_v8 = vpop.f32.mrf.mxu3 }
 0x28d   : > { %v2759_v0 = vadd.f32 %v2749_v6, %v2721_v36  ;;  %v2471_v44 = vadd.f32 %v2459_v8, %v4185_v10 }
 0x28e   : > { %v2750_v15 = vadd.f32 %v4190_v46, %v2645_v41 }
 0x28f   : > { %v2769_v48 = vmax.f32 %v2759_v0, 0.0  ;;  %v2550_v3 = vadd.f32 %v2538_v40, %v2471_v44 }
 0x291   : > { %2779 = vst.msk [vmem:[%s4198_s20 + $0x18] sm:$0xff] %vm1680_vm13, %v2769_v48 }
 0x293   : > { %v2628_v11 = vpop.f32.mrf.mxu1 }
 0x294   : > { %v2724_v37 = vpop.f32.mrf.mxu2  ;;  %v2646_v29 = vadd.f32 %v2628_v11, %v2546_v35 }
 0x295   : > { %v2760_v5 = vadd.f32 %v2750_v15, %v2724_v37 }
 0x296   : > { %v2751_v63 = vadd.f32 %v4190_v46, %v2646_v29 }
 0x297   : > { %v2770_v49 = vmax.f32 %v2760_v5, 0.0 }
 0x299   : > { %2780 = vst.msk [vmem:[%s4198_s20 + $0x20] sm:$0xff] %vm1680_vm13, %v2770_v49 }
 0x29b   : > { %v2631_v60 = vpop.f32.mrf.mxu1 }
 0x29c   : > { %v2727_v20 = vpop.f32.mrf.mxu2  ;;  %v2647_v43 = vadd.f32 %v2631_v60, %v2547_v4 }
 0x29d   : > { %v2761_v39 = vadd.f32 %v2751_v63, %v2727_v20 }
 0x29e   : > { %v2752_v59 = vadd.f32 %v4190_v46, %v2647_v43 }
 0x29f   : > { %v2771_v52 = vmax.f32 %v2761_v39, 0.0 }
 0x2a1   : > { %2781 = vst.msk [vmem:[%s4198_s20 + $0x28] sm:$0xff] %vm1680_vm13, %v2771_v52 }
 0x2a3   : > { %v2633_v14 = vpop.f32.mrf.mxu1 }
 0x2a4   : > { %v2730_v19 = vpop.f32.mrf.mxu2  ;;  %v2648_v50 = vadd.f32 %v2633_v14, %v2548_v31 }
 0x2a5   : > { %v2762_v47 = vadd.f32 %v2752_v59, %v2730_v19 }
 0x2a6   : > { %v2753_v22 = vadd.f32 %v4190_v46, %v2648_v50 }
 0x2a7   : > { %v2772_v33 = vmax.f32 %v2762_v47, 0.0 }
 0x2a9   : > { %2782 = vst.msk [vmem:[%s4198_s20 + $0x30] sm:$0xff] %vm1680_vm13, %v2772_v33 }
 0x2ab   : > { %v2636_v13 = vpop.f32.mrf.mxu1 }
 0x2ac   : > { %v2733_v34 = vpop.f32.mrf.mxu2  ;;  %v2649_v56 = vadd.f32 %v2636_v13, %v2549_v57 }
 0x2ad   : > { %v2763_v18 = vadd.f32 %v2753_v22, %v2733_v34 }
 0x2ae   : > { %v2754_v55 = vadd.f32 %v4190_v46, %v2649_v56 }
 0x2af   : > { %v2773_v54 = vmax.f32 %v2763_v18, 0.0 }
 0x2b1   : > { %2783 = vst.msk [vmem:[%s4198_s20 + $0x38] sm:$0xff] %vm1680_vm13, %v2773_v54 }
 0x2b3   : > { %v2638_v1 = vpop.f32.mrf.mxu1 }
 0x2b4   : > { %v2736_v25 = vpop.f32.mrf.mxu2  ;;  %v2650_v16 = vadd.f32 %v2638_v1, %v2550_v3 }
 0x2b5   : > { %v2764_v27 = vadd.f32 %v2754_v55, %v2736_v25 }
 0x2b6   : > { %v2755_v42 = vadd.f32 %v4190_v46, %v2650_v16 }
 0x2b7   : > { %v2774_v61 = vmax.f32 %v2764_v27, 0.0 }
 0x2b9   : > { %2784 = vst.msk [vmem:[%s4198_s20 + $0x40] sm:$0xff] %vm1680_vm13, %v2774_v61 }
 0x2bc   : > { %v2739_v45 = vpop.f32.mrf.mxu2 }
 0x2bd   : > { %v2765_v51 = vadd.f32 %v2755_v42, %v2739_v45 }
 0x2bf   : > { %v2775_v30 = vmax.f32 %v2765_v51, 0.0 }
 0x2c1   : > { %2785 = vst.msk [vmem:[%s4198_s20 + $0x48] sm:$0xff] %vm1680_vm13, %v2775_v30 }
 0x2c2 PF: > { %s18_s27 = sadd.s32 1, %s3305_s27  }
 0x2c3   : > { %p15_p4 = scmp.ge.s32.totalorder %s18_s27, 4  }
 0x2c5   :  { %17 = sbr.rel (!%p15_p4) target bundleno = 1 (0x1), region = 85 }

</bundles_post_ra>
